<compile_context>
chip_gen: v7x
topology: tpu7x:2x2x1
jax: 0.10.0
libtpu: 0.0.40
codegen_flags: <defaults>
</compile_context>

<pallas_src>
import functools

import jax
import jax.numpy as jnp
from jax.experimental import pallas as pl
from jax.experimental.pallas import tpu as pltpu


_LANE = 128  # lane width; N is zero-padded to (at least) a multiple of this.


def _round_up(x, m):
    return ((x + m - 1) // m) * m


def _select_tiling(n):
    """Return (Np, tm, tk): padded node count, row-block and K-block sizes.

    Small graphs: single block per graph (pad only to 128).
    Medium graphs (<=8192): 512-wide K tiles, 1024-tall row blocks when they
    divide evenly (bounds zero-padding overhead).
    Large graphs: 1024-wide K tiles, 2048-tall row blocks (>=85% of HBM
    roofline on v6e; keeps v7x out of the step-overhead-bound regime).
    """
    np128 = _round_up(n, _LANE)
    if np128 <= 2048:
        return np128, np128, np128
    if np128 <= 8192:
        tk = 512
        npad = _round_up(np128, tk)
        tm = 1024 if npad % 1024 == 0 else tk
        return npad, tm, tk
    tk = 1024
    npad = _round_up(np128, tk)
    tm = 2048 if npad % 2048 == 0 else tk
    return npad, tm, tk


# ---------------------------------------------------------------------------
# Fused kernel:  per (i, g) row-block (K-reduction over grid axis 2)
#   e_out   = A_g[i, :] @ X_g            (bf16 A, f32 accumulate, f32 out)
#   sum_out = sum_in + (A_g[i, :] @ X_g) (f32 running layer sum, aliased)
# ---------------------------------------------------------------------------
def _propagate_fused_kernel(a_ref, x_ref, sum_in_ref, e_ref, sum_out_ref, acc_ref):
    k = pl.program_id(2)

    @pl.when(k == 0)
    def _init():
        acc_ref[...] = jnp.zeros_like(acc_ref)

    acc_ref[...] += jnp.dot(a_ref[...], x_ref[...].astype(jnp.bfloat16),
                            preferred_element_type=jnp.float32)

    @pl.when(k == pl.num_programs(2) - 1)
    def _finalize():
        acc = acc_ref[...]
        e_ref[...] = acc.astype(e_ref.dtype)
        sum_out_ref[...] = sum_in_ref[...] + acc


def propagate_layer(adj_bf16, x_f32, sum_f32, *, tm, tk):
    """One GCN layer for G stacked graphs.

    adj_bf16: (G, N, N) bf16   x_f32: (G, N, D) f32   sum_f32: (G, N, D) f32
    Returns (e_next f32 (G,N,D), sum_next f32 (G,N,D)).
    """
    G, N, K = adj_bf16.shape
    D = x_f32.shape[-1]
    assert N % tm == 0 and K % tk == 0

    # Double-buffered working set (bytes): A + X + sum_in + e + sum_out, plus acc.
    working_set = 2 * (tm * tk * 2 + tk * D * 4 + 3 * tm * D * 4) + tm * D * 4
    vmem_limit = min(max(2 * working_set, 16 * 1024 * 1024), 48 * 1024 * 1024)

    cost = pl.CostEstimate(
        flops=2 * G * N * K * D,
        bytes_accessed=G * N * K * 2                # A stream (bf16)
        + G * (N // tm) * K * D * 4                 # X re-fetched per row block
        + 3 * G * N * D * 4,                        # sum_in read + e/sum writes
        transcendentals=0,
    )

    return pl.pallas_call(
        _propagate_fused_kernel,
        out_shape=(jax.ShapeDtypeStruct((G, N, D), jnp.float32),
                   jax.ShapeDtypeStruct((G, N, D), jnp.float32)),
        grid_spec=pltpu.PrefetchScalarGridSpec(
            num_scalar_prefetch=0,
            # Row-block axis first so the large parallel axis leads megacore
            # sharding; K reduction is innermost.
            grid=(N // tm, G, K // tk),
            in_specs=[
                # A tile for graph g, row-block i, K-block k
                pl.BlockSpec((None, tm, tk), lambda i, g, k: (g, i, k)),
                # X tile for graph g, K-block k (full D)
                pl.BlockSpec((None, tk, D), lambda i, g, k: (g, k, 0)),
                # running layer sum (k-invariant; read once per (i, g))
                pl.BlockSpec((None, tm, D), lambda i, g, k: (g, i, 0)),
            ],
            out_specs=[
                pl.BlockSpec((None, tm, D), lambda i, g, k: (g, i, 0)),
                pl.BlockSpec((None, tm, D), lambda i, g, k: (g, i, 0)),
            ],
            scratch_shapes=[pltpu.VMEM((tm, D), jnp.float32)],
        ),
        compiler_params=pltpu.CompilerParams(
            dimension_semantics=("parallel", "parallel", "arbitrary"),
            vmem_limit_bytes=vmem_limit),
        cost_estimate=cost,
        # sum_f32 (input 2) updated in place into the second output.
        input_output_aliases={2: 1},
    )(adj_bf16, x_f32, sum_f32)


# ---------------------------------------------------------------------------
# Forward pass (mirrors LightGCN_SSL.forward)
# ---------------------------------------------------------------------------
def lightgcn_ssl_forward(user_embed, item_embed, norm_adj, sub_graph1, sub_graph2,
                         user, pos_item, neg_item, *, layer_num):
    n_user = user_embed.shape[0]
    emb0 = jnp.concatenate([user_embed, item_embed], axis=0)       # (N, D) f32
    N, D = emb0.shape

    # Batch the three independent propagations on a leading graph axis.
    adj = jnp.stack([norm_adj, sub_graph1, sub_graph2], axis=0)    # (3, N, N)

    Np, tm, tk = _select_tiling(N)
    pad = Np - N
    if pad:
        adj = jnp.pad(adj, ((0, 0), (0, pad), (0, pad)))
        emb0_p = jnp.pad(emb0, ((0, pad), (0, 0)))
    else:
        emb0_p = emb0

    # bf16 A (dominant HBM stream); f32 embeddings / running layer sum.
    adj_bf = adj.astype(jnp.bfloat16)                              # (3, Np, Np)
    x = jnp.broadcast_to(emb0_p.astype(jnp.float32), (3, Np, D))   # layer-k embeddings
    s = jnp.broadcast_to(emb0_p.astype(jnp.float32), (3, Np, D))   # running sum (layer 0)

    for _ in range(layer_num):
        x, s = propagate_layer(adj_bf, x, s, tm=tm, tk=tk)

    mean = (s * (1.0 / (layer_num + 1)))[:, :N, :]                 # (3, N, D) f32
    all_e, all_1, all_2 = mean[0], mean[1], mean[2]

    # gathers (plain JAX glue)
    user_e, item_e = all_e[:n_user], all_e[n_user:]
    user_1, item_1 = all_1[:n_user], all_1[n_user:]
    user_2, item_2 = all_2[:n_user], all_2[n_user:]

    u = user_e[user]
    pi = item_e[pos_item]
    ni = item_e[neg_item]

    u1 = user_1[user]
    fi1 = jnp.concatenate([item_1[pos_item], item_1[neg_item]], axis=0)

    u2 = user_2[user]
    fi2 = jnp.concatenate([item_2[pos_item], item_2[neg_item]], axis=0)

    og_results = (u, pi, ni)
    sub1_results = (u1, fi1)
    sub2_results = (u2, fi2)
    return og_results, sub1_results, sub2_results


# ---------------------------------------------------------------------------
# Pure-JAX f32 reference (mirrors the PyTorch forward exactly)
# ---------------------------------------------------------------------------
def reference_forward(user_embed, item_embed, norm_adj, sub_graph1, sub_graph2,
                      user, pos_item, neg_item, *, layer_num):
    n_user = user_embed.shape[0]
    emb0 = jnp.concatenate([user_embed, item_embed], axis=0)

    def prop(adj):
        layers = [emb0]
        e = emb0
        for _ in range(layer_num):
            e = adj @ e
            layers.append(e)
        return jnp.mean(jnp.stack(layers, axis=0), axis=0)

    all_e, all_1, all_2 = prop(norm_adj), prop(sub_graph1), prop(sub_graph2)
    user_e, item_e = all_e[:n_user], all_e[n_user:]
    user_1, item_1 = all_1[:n_user], all_1[n_user:]
    user_2, item_2 = all_2[:n_user], all_2[n_user:]
    og = (user_e[user], item_e[pos_item], item_e[neg_item])
    s1 = (user_1[user], jnp.concatenate([item_1[pos_item], item_1[neg_item]], 0))
    s2 = (user_2[user], jnp.concatenate([item_2[pos_item], item_2[neg_item]], 0))
    return og, s1, s2


# ---------------------------------------------------------------------------
# Deterministic synthetic setup
# ---------------------------------------------------------------------------
def xavier_uniform(key, shape):
    fan_in, fan_out = shape
    bound = (6.0 / (fan_in + fan_out)) ** 0.5
    return jax.random.uniform(key, shape, jnp.float32, -bound, bound)


def make_norm_adj(key, n):
    # synthetic dense "normalized adjacency": random nonneg weights, row-normalized.
    a = jax.random.uniform(key, (n, n), jnp.float32, 0.0, 1.0)
    a = a * (a > 0.7)                                   # sparsify a bit
    row_sum = jnp.sum(a, axis=1, keepdims=True) + 1e-8
    return a / row_sum


if __name__ == "__main__":
    # Non-multiple-of-128 sizes to exercise the padding path.
    n_user, n_item = 100, 92          # N = 192 -> padded to 256
    embed_size = 128
    layer_num = 2
    batch = 4
    N = n_user + n_item

    key = jax.random.PRNGKey(0)
    k_ue, k_ie, k_a, k_g1, k_g2, k_u, k_p, k_n = jax.random.split(key, 8)

    user_embed = xavier_uniform(k_ue, (n_user, embed_size))
    item_embed = xavier_uniform(k_ie, (n_item, embed_size))
    norm_adj = make_norm_adj(k_a, N)
    sub_graph1 = make_norm_adj(k_g1, N)
    sub_graph2 = make_norm_adj(k_g2, N)

    user = jax.random.randint(k_u, (batch,), 0, n_user)
    pos_item = jax.random.randint(k_p, (batch,), 0, n_item)
    neg_item = jax.random.randint(k_n, (batch,), 0, n_item)

    fwd = jax.jit(functools.partial(lightgcn_ssl_forward, layer_num=layer_num))
    og, s1, s2 = fwd(user_embed, item_embed, norm_adj, sub_graph1, sub_graph2,
                     user, pos_item, neg_item)
    jax.block_until_ready((og, s1, s2))

    # shape checks
    assert og[0].shape == (batch, embed_size)
    assert og[1].shape == (batch, embed_size)
    assert og[2].shape == (batch, embed_size)
    assert s1[0].shape == (batch, embed_size)
    assert s1[1].shape == (2 * batch, embed_size)
    assert s2[1].shape == (2 * batch, embed_size)

    # numerical check vs pure-JAX f32 reference (loose tol: bf16 A on the MXU)
    ref = reference_forward(user_embed, item_embed, norm_adj, sub_graph1, sub_graph2,
                            user, pos_item, neg_item, layer_num=layer_num)
    for got, want in zip(jax.tree_util.tree_leaves((og, s1, s2)),
                         jax.tree_util.tree_leaves(ref)):
        assert got.shape == want.shape
        max_err = float(jnp.max(jnp.abs(got.astype(jnp.float32) - want)))
        assert max_err < 2e-2, f"max abs err {max_err}"

    print("KERNEL_OK")
</pallas_src>

<mosaic_0001>
module attributes {stable_mosaic.version = 11 : i64} {
  func.func @_propagate_fused_kernel(%arg0: i32, %arg1: i32, %arg2: i32, %arg3: memref<1x256x256xbf16, #tpu.memory_space<vmem>>, %arg4: memref<1x256x128xf32, #tpu.memory_space<vmem>>, %arg5: memref<1x256x128xf32, #tpu.memory_space<vmem>>, %arg6: memref<1x256x128xf32, #tpu.memory_space<vmem>>, %arg7: memref<1x256x128xf32, #tpu.memory_space<vmem>>, %arg8: memref<256x128xf32, #tpu.memory_space<vmem>>) attributes {dimension_semantics = [#tpu.dimension_semantics<parallel>, #tpu.dimension_semantics<parallel>, #tpu.dimension_semantics<arbitrary>], iteration_bounds = array<i64: 1, 3, 1>, scalar_prefetch = 0 : i64, scratch_operands = 1 : i64, tpu.core_type = #tpu.core_type<tc>, window_params = [{transform_indices = @transform_0, window_bounds = array<i64: 1, 256, 256>}, {transform_indices = @transform_1, window_bounds = array<i64: 1, 256, 128>}, {transform_indices = @transform_2, window_bounds = array<i64: 1, 256, 128>}, {transform_indices = @transform_3, window_bounds = array<i64: 1, 256, 128>}, {transform_indices = @transform_4, window_bounds = array<i64: 1, 256, 128>}]} {
    %c0_i32 = arith.constant 0 : i32
    %0 = arith.cmpi eq, %arg2, %c0_i32 : i32
    %1 = arith.extui %0 : i1 to i32
    %c0_i32_0 = arith.constant 0 : i32
    %2 = arith.cmpi ne, %1, %c0_i32_0 : i32
    scf.if %2 {
      %cst_12 = arith.constant 0.000000e+00 : f32
      %15 = vector.broadcast %cst_12 : f32 to vector<256x128xf32>
      %c0_13 = arith.constant 0 : index
      %c0_14 = arith.constant 0 : index
      %16 = vector.load %arg8[%c0_13, %c0_14] : memref<256x128xf32, #tpu.memory_space<vmem>>, vector<256x128xf32>
      tpu.vector_store %arg8[%c0_13, %c0_14], %15 {strides = array<i32>} : memref<256x128xf32, #tpu.memory_space<vmem>>, vector<256x128xf32>,
    } else {
    }
    %c0 = arith.constant 0 : index
    %c0_1 = arith.constant 0 : index
    %3 = vector.load %arg8[%c0, %c0_1] : memref<256x128xf32, #tpu.memory_space<vmem>>, vector<256x128xf32>
    %c0_2 = arith.constant 0 : index
    %c0_3 = arith.constant 0 : index
    %c0_4 = arith.constant 0 : index
    %4 = vector.load %arg3[%c0_2, %c0_3, %c0_4] : memref<1x256x256xbf16, #tpu.memory_space<vmem>>, vector<1x256x256xbf16>
    %5 = vector.shape_cast %4 : vector<1x256x256xbf16> to vector<256x256xbf16>
    %c0_5 = arith.constant 0 : index
    %c0_6 = arith.constant 0 : index
    %c0_7 = arith.constant 0 : index
    %6 = vector.load %arg4[%c0_5, %c0_6, %c0_7] : memref<1x256x128xf32, #tpu.memory_space<vmem>>, vector<1x256x128xf32>
    %7 = vector.shape_cast %6 : vector<1x256x128xf32> to vector<256x128xf32>
    %8 = arith.truncf %7 : vector<256x128xf32> to vector<256x128xbf16>
    %cst = arith.constant dense<0.000000e+00> : vector<256x128xf32>
    %9 = tpu.matmul %5, %8, %cst {dimension_numbers = #tpu.dot_dimension_numbers<[1], [0], [0], [1], [0, 0, 1, 1], [], []>} : vector<256x256xbf16>, vector<256x128xbf16>, vector<256x128xf32> -> vector<256x128xf32>
    %10 = arith.addf %3, %9 : vector<256x128xf32>
    %c0_8 = arith.constant 0 : index
    %c0_9 = arith.constant 0 : index
    %11 = vector.load %arg8[%c0_8, %c0_9] : memref<256x128xf32, #tpu.memory_space<vmem>>, vector<256x128xf32>
    tpu.vector_store %arg8[%c0_8, %c0_9], %10 {strides = array<i32>} : memref<256x128xf32, #tpu.memory_space<vmem>>, vector<256x128xf32>,
    %c0_i32_10 = arith.constant 0 : i32
    %12 = arith.cmpi eq, %arg2, %c0_i32_10 : i32
    %13 = arith.extui %12 : i1 to i32
    %c0_i32_11 = arith.constant 0 : i32
    %14 = arith.cmpi ne, %13, %c0_i32_11 : i32
    scf.if %14 {
      %c0_12 = arith.constant 0 : index
      %c0_13 = arith.constant 0 : index
      %15 = vector.load %arg8[%c0_12, %c0_13] : memref<256x128xf32, #tpu.memory_space<vmem>>, vector<256x128xf32>
      %c0_14 = arith.constant 0 : index
      %c0_15 = arith.constant 0 : index
      %c0_16 = arith.constant 0 : index
      %16 = vector.load %arg6[%c0_14, %c0_15, %c0_16] : memref<1x256x128xf32, #tpu.memory_space<vmem>>, vector<1x256x128xf32>
      %17 = vector.shape_cast %16 : vector<1x256x128xf32> to vector<256x128xf32>
      %18 = vector.shape_cast %15 : vector<256x128xf32> to vector<1x256x128xf32>
      tpu.vector_store %arg6[%c0_14, %c0_15, %c0_16], %18 {strides = array<i32>} : memref<1x256x128xf32, #tpu.memory_space<vmem>>, vector<1x256x128xf32>,
      %c0_17 = arith.constant 0 : index
      %c0_18 = arith.constant 0 : index
      %c0_19 = arith.constant 0 : index
      %19 = vector.load %arg5[%c0_17, %c0_18, %c0_19] : memref<1x256x128xf32, #tpu.memory_space<vmem>>, vector<1x256x128xf32>
      %20 = vector.shape_cast %19 : vector<1x256x128xf32> to vector<256x128xf32>
      %21 = arith.addf %20, %15 : vector<256x128xf32>
      %c0_20 = arith.constant 0 : index
      %c0_21 = arith.constant 0 : index
      %c0_22 = arith.constant 0 : index
      %22 = vector.load %arg7[%c0_20, %c0_21, %c0_22] : memref<1x256x128xf32, #tpu.memory_space<vmem>>, vector<1x256x128xf32>
      %23 = vector.shape_cast %22 : vector<1x256x128xf32> to vector<256x128xf32>
      %24 = vector.shape_cast %21 : vector<256x128xf32> to vector<1x256x128xf32>
      tpu.vector_store %arg7[%c0_20, %c0_21, %c0_22], %24 {strides = array<i32>} : memref<1x256x128xf32, #tpu.memory_space<vmem>>, vector<1x256x128xf32>,
    } else {
    }
    return
  }
  func.func @transform_0(%arg0: i32, %arg1: i32, %arg2: i32) -> (i32, i32, i32) {
    %c0_i32 = arith.constant 0 : i32
    return %arg1, %arg0, %arg2 : i32, i32, i32
  }
  func.func @transform_1(%arg0: i32, %arg1: i32, %arg2: i32) -> (i32, i32, i32) {
    %c0_i32 = arith.constant 0 : i32
    %c0_i32_0 = arith.constant 0 : i32
    return %arg1, %arg2, %c0_i32 : i32, i32, i32
  }
  func.func @transform_2(%arg0: i32, %arg1: i32, %arg2: i32) -> (i32, i32, i32) {
    %c0_i32 = arith.constant 0 : i32
    %c0_i32_0 = arith.constant 0 : i32
    return %arg1, %arg0, %c0_i32 : i32, i32, i32
  }
  func.func @transform_3(%arg0: i32, %arg1: i32, %arg2: i32) -> (i32, i32, i32) {
    %c0_i32 = arith.constant 0 : i32
    %c0_i32_0 = arith.constant 0 : i32
    return %arg1, %arg0, %c0_i32 : i32, i32, i32
  }
  func.func @transform_4(%arg0: i32, %arg1: i32, %arg2: i32) -> (i32, i32, i32) {
    %c0_i32 = arith.constant 0 : i32
    %c0_i32_0 = arith.constant 0 : i32
    return %arg1, %arg0, %c0_i32 : i32, i32, i32
  }
}

module attributes {stable_mosaic.version = 11 : i64} {
  func.func @_propagate_fused_kernel(%arg0: i32, %arg1: i32, %arg2: i32, %arg3: memref<1x256x256xbf16, #tpu.memory_space<vmem>>, %arg4: memref<1x256x128xf32, #tpu.memory_space<vmem>>, %arg5: memref<1x256x128xf32, #tpu.memory_space<vmem>>, %arg6: memref<1x256x128xf32, #tpu.memory_space<vmem>>, %arg7: memref<1x256x128xf32, #tpu.memory_space<vmem>>, %arg8: memref<256x128xf32, #tpu.memory_space<vmem>>) attributes {dimension_semantics = [#tpu.dimension_semantics<parallel>, #tpu.dimension_semantics<parallel>, #tpu.dimension_semantics<arbitrary>], iteration_bounds = array<i64: 1, 3, 1>, scalar_prefetch = 0 : i64, scratch_operands = 1 : i64, tpu.core_type = #tpu.core_type<tc>, window_params = [{transform_indices = @transform_0, window_bounds = array<i64: 1, 256, 256>}, {transform_indices = @transform_1, window_bounds = array<i64: 1, 256, 128>}, {transform_indices = @transform_2, window_bounds = array<i64: 1, 256, 128>}, {transform_indices = @transform_3, window_bounds = array<i64: 1, 256, 128>}, {transform_indices = @transform_4, window_bounds = array<i64: 1, 256, 128>}]} {
    %c0_i32 = arith.constant 0 : i32
    %0 = arith.cmpi eq, %arg2, %c0_i32 : i32
    %1 = arith.extui %0 : i1 to i32
    %c0_i32_0 = arith.constant 0 : i32
    %2 = arith.cmpi ne, %1, %c0_i32_0 : i32
    scf.if %2 {
      %cst_12 = arith.constant 0.000000e+00 : f32
      %15 = vector.broadcast %cst_12 : f32 to vector<256x128xf32>
      %c0_13 = arith.constant 0 : index
      %c0_14 = arith.constant 0 : index
      %16 = vector.load %arg8[%c0_13, %c0_14] : memref<256x128xf32, #tpu.memory_space<vmem>>, vector<256x128xf32>
      tpu.vector_store %arg8[%c0_13, %c0_14], %15 {strides = array<i32>} : memref<256x128xf32, #tpu.memory_space<vmem>>, vector<256x128xf32>,
    } else {
    }
    %c0 = arith.constant 0 : index
    %c0_1 = arith.constant 0 : index
    %3 = vector.load %arg8[%c0, %c0_1] : memref<256x128xf32, #tpu.memory_space<vmem>>, vector<256x128xf32>
    %c0_2 = arith.constant 0 : index
    %c0_3 = arith.constant 0 : index
    %c0_4 = arith.constant 0 : index
    %4 = vector.load %arg3[%c0_2, %c0_3, %c0_4] : memref<1x256x256xbf16, #tpu.memory_space<vmem>>, vector<1x256x256xbf16>
    %5 = vector.shape_cast %4 : vector<1x256x256xbf16> to vector<256x256xbf16>
    %c0_5 = arith.constant 0 : index
    %c0_6 = arith.constant 0 : index
    %c0_7 = arith.constant 0 : index
    %6 = vector.load %arg4[%c0_5, %c0_6, %c0_7] : memref<1x256x128xf32, #tpu.memory_space<vmem>>, vector<1x256x128xf32>
    %7 = vector.shape_cast %6 : vector<1x256x128xf32> to vector<256x128xf32>
    %8 = arith.truncf %7 : vector<256x128xf32> to vector<256x128xbf16>
    %cst = arith.constant dense<0.000000e+00> : vector<256x128xf32>
    %9 = tpu.matmul %5, %8, %cst {dimension_numbers = #tpu.dot_dimension_numbers<[1], [0], [0], [1], [0, 0, 1, 1], [], []>} : vector<256x256xbf16>, vector<256x128xbf16>, vector<256x128xf32> -> vector<256x128xf32>
    %10 = arith.addf %3, %9 : vector<256x128xf32>
    %c0_8 = arith.constant 0 : index
    %c0_9 = arith.constant 0 : index
    %11 = vector.load %arg8[%c0_8, %c0_9] : memref<256x128xf32, #tpu.memory_space<vmem>>, vector<256x128xf32>
    tpu.vector_store %arg8[%c0_8, %c0_9], %10 {strides = array<i32>} : memref<256x128xf32, #tpu.memory_space<vmem>>, vector<256x128xf32>,
    %c0_i32_10 = arith.constant 0 : i32
    %12 = arith.cmpi eq, %arg2, %c0_i32_10 : i32
    %13 = arith.extui %12 : i1 to i32
    %c0_i32_11 = arith.constant 0 : i32
    %14 = arith.cmpi ne, %13, %c0_i32_11 : i32
    scf.if %14 {
      %c0_12 = arith.constant 0 : index
      %c0_13 = arith.constant 0 : index
      %15 = vector.load %arg8[%c0_12, %c0_13] : memref<256x128xf32, #tpu.memory_space<vmem>>, vector<256x128xf32>
      %c0_14 = arith.constant 0 : index
      %c0_15 = arith.constant 0 : index
      %c0_16 = arith.constant 0 : index
      %16 = vector.load %arg6[%c0_14, %c0_15, %c0_16] : memref<1x256x128xf32, #tpu.memory_space<vmem>>, vector<1x256x128xf32>
      %17 = vector.shape_cast %16 : vector<1x256x128xf32> to vector<256x128xf32>
      %18 = vector.shape_cast %15 : vector<256x128xf32> to vector<1x256x128xf32>
      tpu.vector_store %arg6[%c0_14, %c0_15, %c0_16], %18 {strides = array<i32>} : memref<1x256x128xf32, #tpu.memory_space<vmem>>, vector<1x256x128xf32>,
      %c0_17 = arith.constant 0 : index
      %c0_18 = arith.constant 0 : index
      %c0_19 = arith.constant 0 : index
      %19 = vector.load %arg5[%c0_17, %c0_18, %c0_19] : memref<1x256x128xf32, #tpu.memory_space<vmem>>, vector<1x256x128xf32>
      %20 = vector.shape_cast %19 : vector<1x256x128xf32> to vector<256x128xf32>
      %21 = arith.addf %20, %15 : vector<256x128xf32>
      %c0_20 = arith.constant 0 : index
      %c0_21 = arith.constant 0 : index
      %c0_22 = arith.constant 0 : index
      %22 = vector.load %arg7[%c0_20, %c0_21, %c0_22] : memref<1x256x128xf32, #tpu.memory_space<vmem>>, vector<1x256x128xf32>
      %23 = vector.shape_cast %22 : vector<1x256x128xf32> to vector<256x128xf32>
      %24 = vector.shape_cast %21 : vector<256x128xf32> to vector<1x256x128xf32>
      tpu.vector_store %arg7[%c0_20, %c0_21, %c0_22], %24 {strides = array<i32>} : memref<1x256x128xf32, #tpu.memory_space<vmem>>, vector<1x256x128xf32>,
    } else {
    }
    return
  }
  func.func @transform_0(%arg0: i32, %arg1: i32, %arg2: i32) -> (i32, i32, i32) {
    %c0_i32 = arith.constant 0 : i32
    return %arg1, %arg0, %arg2 : i32, i32, i32
  }
  func.func @transform_1(%arg0: i32, %arg1: i32, %arg2: i32) -> (i32, i32, i32) {
    %c0_i32 = arith.constant 0 : i32
    %c0_i32_0 = arith.constant 0 : i32
    return %arg1, %arg2, %c0_i32 : i32, i32, i32
  }
  func.func @transform_2(%arg0: i32, %arg1: i32, %arg2: i32) -> (i32, i32, i32) {
    %c0_i32 = arith.constant 0 : i32
    %c0_i32_0 = arith.constant 0 : i32
    return %arg1, %arg0, %c0_i32 : i32, i32, i32
  }
  func.func @transform_3(%arg0: i32, %arg1: i32, %arg2: i32) -> (i32, i32, i32) {
    %c0_i32 = arith.constant 0 : i32
    %c0_i32_0 = arith.constant 0 : i32
    return %arg1, %arg0, %c0_i32 : i32, i32, i32
  }
  func.func @transform_4(%arg0: i32, %arg1: i32, %arg2: i32) -> (i32, i32, i32) {
    %c0_i32 = arith.constant 0 : i32
    %c0_i32_0 = arith.constant 0 : i32
    return %arg1, %arg0, %c0_i32 : i32, i32, i32
  }
}

</mosaic_0001>

<bundles_post_ra>
// kernel: lightgcn_ssl_forward.3
= control target key start
LH: loop header
LB: loop body
LE: loop exit
PB: predicated region body
PF: predicated region fallthrough
CT: control target
= control target key end

     0   :  { %10 = vsyncpa [#allocation4], 0  ;;  %s2019_s0 = inlined_call_operand.vmem [shape: bf16[3,256,256], index: 0, kind: input, shape index: {}]   ;;  %s2020_s1 = inlined_call_operand.vmem [shape: f32[3,256,128], index: 1, kind: input, shape index: {}]   ;;  %s2021_s2 = inlined_call_operand.vmem [shape: f32[3,256,128], index: 2, kind: input, shape index: {}, may-alias: {2,4}]   ;;  %s2022_s3 = inlined_call_operand.hbm [shape: f32[3,256,128], index: 3, kind: output, shape index: {0}]   ;;  %s2023_s4 = inlined_call_operand.vmem [shape: f32[3,256,128], index: 4, kind: output, shape index: {1}, may-alias: {2,4}]  }
   0x1   :  { %12 = vsyncpa [#allocation4 + $0x1], 0  ;;  %s1633_s15 = smov 0   ;;  %s1635_s16 = smov 0  }
   0x2   :  { %s1637_s17 = smov 0   ;;  %s1639_s18 = smov 0  }
   0x3   :  { %s1641_s19 = smov 0   ;;  %s1643_s20 = smov 0  }
   0x4 LB: > { %s1236_s21 = sadd.s32 4294967295, %s1603_s20   ;;  %s1237_s22 = sadd.s32 4294967294, %s1603_s20   ;;  %s1603_s20 = sphi %s1643_s20, %s18_s20   ;;  %s1599_s19 = sphi %s1641_s19, %s2030_s19   ;;  %s1595_s18 = sphi %s1639_s18, %s2029_s18   ;;  %s1591_s17 = sphi %s1637_s17, %s2028_s17   ;;  %s1587_s16 = sphi %s1635_s16, %s2027_s16   ;;  %s1583_s15 = sphi %s1633_s15, %s2026_s15  }
   0x5   : > { %s33_s23 = sadd.s32 1, %s1599_s19  ;;  %s132_s24 = sadd.s32 1, %s1591_s17 }
   0x6   : > { %p35_p0 = scmp.ge.s32.totalorder %s33_s23, 3  ;;  %p142_p1 = scmp.ne.s32.totalorder %s1591_s17, %s1587_s16 }
   0x7   : > { %p143_p2 = scmp.eq.s32.totalorder %s1236_s21, 2  ;;  %p148_p3 = scmp.ne.s32.totalorder %s1587_s16, %s1583_s15 }
   0x8   : > { %s2032_s23 = smov (%p35_p0, %s33_s23), 0  ;;  %p149_p5 = scmp.eq.s32.totalorder %s1237_s22, 2 }
   0x9   : > { %p1673_p4 = por %p143_p2, %p142_p1  ;;  %s127_s26 = ssub.s32 %s1599_s19, %s2032_s23 }
   0xa   : > { %p1240_p6 = scmp.ge.s32.totalorder %s1603_s20, 1  ;;  %p130_p7 = scmp.eq.s32.totalorder %s127_s26, 0 }
   0xb   : > { %p1680_p8 = por %p149_p5, %p148_p3  ;;  %p240_p9 = scmp.lt.s32.totalorder %s1603_s20, 4 }
   0xc   : > { %s1686_s28 = scalar_select %p130_p7, %s1591_s17, %s132_s24  }
   0xd   : > { %p241_p10 = pnand %p1240_p6, %p240_p9 }
   0xe   : > { %p304_p11 = scmp.lt.s32.totalorder (!%p241_p10), %s1595_s18, 2  ;;  %s288_s11 = sand.u32 (!%p241_p10), 1, %s1587_s16  }
   0xf   : > { %244 = sbr.rel (%p241_p10) target bundleno = 350 (0x15e), region = 32  ;;  %s1777_s21 = sshll.u32 (!%p241_p10), %s288_s11, 8 }
  0x16   : > { %s305_s29 = scalar_select %p304_p11, %s1595_s18, 2 }
  0x18   : > { %s1690_s30 = sshll.u32 %s305_s29, 8  ;;  %s1870_s29 = scalar_lea.vmem [#allocation3], %s1777_s21 }
  0x19   : > { %s1696_s7 = scalar_lea.vmem %s2020_s1, %s1690_s30  ;;  %s1716_s10 = scalar_lea.vmem %s2019_s0, %s1690_s30 }
  0x1a   : > { %v466_v0 = vld [vmem:[%s1696_s7 + $0x80] sm:$0xff]  ;;  %v467_v1 = vld [vmem:[%s1696_s7 + $0x88] sm:$0xff]  ;;  %v468_v5 = vld [vmem:[%s1696_s7 + $0x90] sm:$0xff]  ;;  %s1773_s14 = scalar_lea.vmem %s2021_s2, %s1690_s30  ;;  %s1858_s26 = scalar_lea.vmem %s2023_s4, %s1690_s30 }
  0x1b   : > { %v450_v2 = vld [vmem:[%s1696_s7] sm:$0xff]  ;;  %v490_v3 = vpack.c.bf16 %v467_v1, %v466_v0  ;;  %v451_v4 = vld [vmem:[%s1696_s7 + $0x8] sm:$0xff]  ;;  %v469_v6 = vld [vmem:[%s1696_s7 + $0x98] sm:$0xff]  ;;  %s1291_s30 = sshll.u32 %s1595_s18, 12  ;;  %s1071_s5 = sshll.u32 %s1870_s29, 4  ;;  %s1957_s5 = int_to_ptr.vmem [resolvable:$true] %s1071_s5 }
  0x1c   : > { %v482_v7 = vpack.c.bf16 %v451_v4, %v450_v2  ;;  %v491_v8 = vpack.c.bf16 %v469_v6, %v468_v5  ;;  %v452_v9 = vld [vmem:[%s1696_s7 + $0x10] sm:$0xff]  ;;  %v453_v10 = vld [vmem:[%s1696_s7 + $0x18] sm:$0xff]  ;;  %v470_v11 = vld [vmem:[%s1696_s7 + $0xa0] sm:$0xff]  ;;  %s1955_s8 = scalar_lea.hbm %s2022_s3, %s1291_s30  ;;  %s1971_s18 = scalar_lea.sflag [#allocation4], %s288_s11 }
  0x1d   : > { %1292 = vmatprep.subr.bf16.mxu0 %v490_v3  ;;  %1404 = vmatprep.subr.bf16.mxu1 %v490_v3  ;;  %v471_v12 = vld [vmem:[%s1696_s7 + $0xa8] sm:$0xff]  ;;  %v483_v13 = vpack.c.bf16 %v453_v10, %v452_v9  ;;  %v454_v15 = vld [vmem:[%s1696_s7 + $0x20] sm:$0xff]  ;;  %v472_v17 = vld [vmem:[%s1696_s7 + $0xb0] sm:$0xff]  ;;  %s1525_s9 = scalar_lea.vmem %s1957_s5, 4096 }
  0x1e   : > { %1293 = vmatpush3.bf16.msra.mxu0 %v482_v7  ;;  %1412 = vmatpush3.bf16.msra.mxu1 %v482_v7  ;;  %v492_v14 = vpack.c.bf16 %v471_v12, %v470_v11  ;;  %v455_v16 = vld [vmem:[%s1696_s7 + $0x28] sm:$0xff]  ;;  %v473_v18 = vld [vmem:[%s1696_s7 + $0xb8] sm:$0xff]  ;;  %v456_v21 = vld [vmem:[%s1696_s7 + $0x30] sm:$0xff]  ;;  %p1526_p12 = scmp.ne.s32.totalorder %s1957_s5, %s1525_s9 }
  0x1f   : > { %1294 = vmatprep.subr.bf16.mxu0 %v491_v8  ;;  %1405 = vmatprep.subr.bf16.mxu1 %v491_v8  ;;  %v484_v19 = vpack.c.bf16 %v455_v16, %v454_v15  ;;  %v493_v20 = vpack.c.bf16 %v473_v18, %v472_v17  ;;  %v457_v22 = vld [vmem:[%s1696_s7 + $0x38] sm:$0xff]  ;;  %v474_v23 = vld [vmem:[%s1696_s7 + $0xc0] sm:$0xff]  ;;  %v475_v24 = vld [vmem:[%s1696_s7 + $0xc8] sm:$0xff] }
  0x20   : > { %v458_v25 = vld [vmem:[%s1696_s7 + $0x40] sm:$0xff]  ;;  %v459_v26 = vld [vmem:[%s1696_s7 + $0x48] sm:$0xff]  ;;  %v485_v28 = vpack.c.bf16 %v457_v22, %v456_v21  ;;  %v476_v29 = vld [vmem:[%s1696_s7 + $0xd0] sm:$0xff]  ;;  %v494_v30 = vpack.c.bf16 %v475_v24, %v474_v23  ;;  %p1527_p13 = pnand %p1526_p12, %p1673_p4 }
  0x21   : > { %v1479_v27 = vld [vmem:[%s1716_s10 + $0x4] ss:$8 sps:$4 sm:$0xff]   ;;  %v477_v32 = vld [vmem:[%s1696_s7 + $0xd8] sm:$0xff]  ;;  %v486_v33 = vpack.c.bf16 %v459_v26, %v458_v25  ;;  %v460_v34 = vld [vmem:[%s1696_s7 + $0x50] sm:$0xff] }
  0x22   : > { %1295 = vmatpush3.bf16.msra.mxu0 %v483_v13  ;;  %1413 = vmatpush3.bf16.msra.mxu1 %v483_v13  ;;  %v1482_v31 = vld [vmem:[%s1716_s10 + $0x84] ss:$8 sps:$4 sm:$0xff]   ;;  %v495_v35 = vpack.c.bf16 %v477_v32, %v476_v29  ;;  %v461_v36 = vld [vmem:[%s1696_s7 + $0x58] sm:$0xff]  ;;  %v480_v43 = vld [vmem:[%s1696_s7 + $0xf0] sm:$0xff]  ;;  %p1528_p0 = pneg %p1527_p13 }
  0x23   : > { %1296 = vmatprep.subr.bf16.mxu0 %v492_v14  ;;  %1406 = vmatprep.subr.bf16.mxu1 %v492_v14  ;;  %v478_v37 = vld [vmem:[%s1696_s7 + $0xe0] sm:$0xff]  ;;  %v479_v38 = vld [vmem:[%s1696_s7 + $0xe8] sm:$0xff]  ;;  %v487_v39 = vpack.c.bf16 %v461_v36, %v460_v34  ;;  %v481_v44 = vld [vmem:[%s1696_s7 + $0xf8] sm:$0xff] }
  0x24   : > { %690 = vmatprep.mubr.bf16.mxu0 %v1479_v27  ;;  %754 = vmatprep.mubr.bf16.mxu1 %v1482_v31  ;;  %v462_v40 = vld [vmem:[%s1696_s7 + $0x60] sm:$0xff]  ;;  %v463_v41 = vld [vmem:[%s1696_s7 + $0x68] sm:$0xff]  ;;  %v496_v42 = vpack.c.bf16 %v479_v38, %v478_v37  ;;  %v464_v46 = vld [vmem:[%s1696_s7 + $0x70] sm:$0xff]  ;;  %v497_v47 = vpack.c.bf16 %v481_v44, %v480_v43 }
  0x25   : > { %v488_v45 = vpack.c.bf16 %v463_v41, %v462_v40  ;;  %v465_v48 = vld [vmem:[%s1696_s7 + $0x78] sm:$0xff]  ;;  %v1477_v50 = vld [vmem:[%s1716_s10] ss:$8 sps:$4 sm:$0xff]   ;;  %v1489_v56 = vld [vmem:[%s1716_s10 + $0x24] ss:$8 sps:$4 sm:$0xff]  }
  0x26   : > { %1297 = vmatpush3.bf16.msra.mxu0 %v484_v19  ;;  %1414 = vmatpush3.bf16.msra.mxu1 %v484_v19  ;;  %v489_v49 = vpack.c.bf16 %v465_v48, %v464_v46  ;;  %v1480_v51 = vld [vmem:[%s1716_s10 + $0x80] ss:$8 sps:$4 sm:$0xff]   ;;  %v1483_v52 = vld [vmem:[%s1716_s10 + $0x14] ss:$8 sps:$4 sm:$0xff]   ;;  %v1487_v54 = vld [vmem:[%s1716_s10 + $0x10] ss:$8 sps:$4 sm:$0xff]  }
  0x27   : > { %1298 = vmatprep.subr.bf16.mxu0 %v493_v20  ;;  %1407 = vmatprep.subr.bf16.mxu1 %v493_v20  ;;  %v1485_v53 = vld [vmem:[%s1716_s10 + $0x94] ss:$8 sps:$4 sm:$0xff]   ;;  %v1488_v55 = vld [vmem:[%s1716_s10 + $0x90] ss:$8 sps:$4 sm:$0xff]   ;;  %v1491_v57 = vld [vmem:[%s1716_s10 + $0xa4] ss:$8 sps:$4 sm:$0xff]  }
  0x28   : > { %v1493_v58 = vld [vmem:[%s1716_s10 + $0x20] ss:$8 sps:$4 sm:$0xff]   ;;  %v1495_v60 = vld [vmem:[%s1716_s10 + $0x34] ss:$8 sps:$4 sm:$0xff]   ;;  %v1499_v62 = vld [vmem:[%s1716_s10 + $0x30] ss:$8 sps:$4 sm:$0xff]  }
  0x29   : > { %v1494_v59 = vld [vmem:[%s1716_s10 + $0xa0] ss:$8 sps:$4 sm:$0xff]   ;;  %v1497_v61 = vld [vmem:[%s1716_s10 + $0xb4] ss:$8 sps:$4 sm:$0xff]   ;;  %v1500_v63 = vld [vmem:[%s1716_s10 + $0xb0] ss:$8 sps:$4 sm:$0xff]  }
  0x2a   : > { %1299 = vmatpush3.bf16.msra.mxu0 %v485_v28  ;;  %1415 = vmatpush3.bf16.msra.mxu1 %v485_v28  ;;  %v1501_v0 = vld [vmem:[%s1716_s10 + $0x44] ss:$8 sps:$4 sm:$0xff]   ;;  %v1505_v2 = vld [vmem:[%s1716_s10 + $0x40] ss:$8 sps:$4 sm:$0xff]   ;;  %v1507_v4 = vld [vmem:[%s1716_s10 + $0x54] ss:$8 sps:$4 sm:$0xff]  }
  0x2b   : > { %1300 = vmatprep.subr.bf16.mxu0 %v494_v30  ;;  %1408 = vmatprep.subr.bf16.mxu1 %v494_v30  ;;  %v1503_v1 = vld [vmem:[%s1716_s10 + $0xc4] ss:$8 sps:$4 sm:$0xff]   ;;  %v1506_v3 = vld [vmem:[%s1716_s10 + $0xc0] ss:$8 sps:$4 sm:$0xff]   ;;  %v1509_v5 = vld [vmem:[%s1716_s10 + $0xd4] ss:$8 sps:$4 sm:$0xff]  }
  0x2c   : > { %v1511_v6 = vld [vmem:[%s1716_s10 + $0x50] ss:$8 sps:$4 sm:$0xff]   ;;  %v1513_v8 = vld [vmem:[%s1716_s10 + $0x64] ss:$8 sps:$4 sm:$0xff]   ;;  %v1517_v10 = vld [vmem:[%s1716_s10 + $0x60] ss:$8 sps:$4 sm:$0xff]  }
  0x2d   : > { %v1512_v7 = vld [vmem:[%s1716_s10 + $0xd0] ss:$8 sps:$4 sm:$0xff]   ;;  %v1515_v9 = vld [vmem:[%s1716_s10 + $0xe4] ss:$8 sps:$4 sm:$0xff]   ;;  %v1518_v11 = vld [vmem:[%s1716_s10 + $0xe0] ss:$8 sps:$4 sm:$0xff]  }
  0x2e   : > { %1301 = vmatpush3.bf16.msra.mxu0 %v486_v33  ;;  %1416 = vmatpush3.bf16.msra.mxu1 %v486_v33  ;;  %v1519_v12 = vld [vmem:[%s1716_s10 + $0x74] ss:$8 sps:$4 sm:$0xff]   ;;  %v1523_v14 = vld [vmem:[%s1716_s10 + $0x70] ss:$8 sps:$4 sm:$0xff]   ;;  %v950_v18 = vld [vmem:[%s1773_s14] sm:$0xff] }
  0x2f   : > { %1302 = vmatprep.subr.bf16.mxu0 %v495_v35  ;;  %1409 = vmatprep.subr.bf16.mxu1 %v495_v35  ;;  %v1521_v13 = vld [vmem:[%s1716_s10 + $0xf4] ss:$8 sps:$4 sm:$0xff]   ;;  %v1524_v15 = vld [vmem:[%s1716_s10 + $0xf0] ss:$8 sps:$4 sm:$0xff]   ;;  %v966_v19 = vld [vmem:[%s1773_s14 + $0x80] sm:$0xff]  ;;  %s1605_s10 = smov [#allocation3]  }
  0x30   : > { %v951_v22 = vld [vmem:[%s1773_s14 + $0x8] sm:$0xff]  ;;  %v952_v24 = vld [vmem:[%s1773_s14 + $0x10] sm:$0xff]  ;;  %v1786_v26 = vld [vmem:[%s1773_s14 + $0x18] sm:$0xff]  ;;  %s1529_s12 = sshll.u32 %s1605_s10, 4  ;;  %s1530_s12 = int_to_ptr.vmem [resolvable:$false] %s1529_s12 }
  0x31   : > { %v967_v23 = vld [vmem:[%s1773_s14 + $0x88] sm:$0xff]  ;;  %v968_v25 = vld [vmem:[%s1773_s14 + $0x90] sm:$0xff]  ;;  %v1789_v27 = vld [vmem:[%s1773_s14 + $0x98] sm:$0xff]  ;;  %s1531_s13 = scalar_lea.vmem %s1530_s12, 8192  ;;  %p1532_p1 = scmp.lt.s32.totalorder %s1957_s5, %s1530_s12 }
  0x32   : > { %1303 = vmatpush3.bf16.msra.mxu0 %v487_v39  ;;  %1417 = vmatpush3.bf16.msra.mxu1 %v487_v39  ;;  %v1792_v28 = vld [vmem:[%s1773_s14 + $0x20] sm:$0xff]  ;;  %v1798_v30 = vld [vmem:[%s1773_s14 + $0x28] sm:$0xff]  ;;  %v1804_v32 = vld [vmem:[%s1773_s14 + $0x30] sm:$0xff]  ;;  %p1533_p2 = scmp.lt.s32.totalorder %s1531_s13, %s1525_s9 }
  0x33   : > { %1304 = vmatprep.subr.bf16.mxu0 %v496_v42  ;;  %1410 = vmatprep.subr.bf16.mxu1 %v496_v42  ;;  %v1795_v29 = vld [vmem:[%s1773_s14 + $0xa0] sm:$0xff]  ;;  %v1801_v31 = vld [vmem:[%s1773_s14 + $0xa8] sm:$0xff]  ;;  %v1807_v33 = vld [vmem:[%s1773_s14 + $0xb0] sm:$0xff] }
  0x34   : > { %v1810_v34 = vld [vmem:[%s1773_s14 + $0x38] sm:$0xff]  ;;  %v1816_v36 = vld [vmem:[%s1773_s14 + $0x40] sm:$0xff]  ;;  %v1822_v38 = vld [vmem:[%s1773_s14 + $0x48] sm:$0xff]  ;;  %p1534_p3 = por %p1533_p2, %p1532_p1 }
  0x35   : > { %v1813_v35 = vld [vmem:[%s1773_s14 + $0xb8] sm:$0xff]  ;;  %v1819_v37 = vld [vmem:[%s1773_s14 + $0xc0] sm:$0xff]  ;;  %v1825_v39 = vld [vmem:[%s1773_s14 + $0xc8] sm:$0xff] }
  0x36   : > { %1305 = vmatpush3.bf16.msra.mxu0 %v488_v45  ;;  %1418 = vmatpush3.bf16.msra.mxu1 %v488_v45  ;;  %v1828_v40 = vld [vmem:[%s1773_s14 + $0x50] sm:$0xff]  ;;  %v1834_v42 = vld [vmem:[%s1773_s14 + $0x58] sm:$0xff]  ;;  %v1840_v44 = vld [vmem:[%s1773_s14 + $0x60] sm:$0xff]  ;;  %p1535_p5 = pnand %p1534_p3, %p1528_p0 }
  0x37   : > { %1306 = vmatprep.subr.bf16.mxu0 %v497_v47  ;;  %1411 = vmatprep.subr.bf16.mxu1 %v497_v47  ;;  %v1831_v41 = vld [vmem:[%s1773_s14 + $0xd0] sm:$0xff]  ;;  %v1837_v43 = vld [vmem:[%s1773_s14 + $0xd8] sm:$0xff]  ;;  %v1843_v45 = vld [vmem:[%s1773_s14 + $0xe0] sm:$0xff] }
  0x3a   : > { %1307 = vmatpush3.bf16.msra.mxu0 %v489_v49  ;;  %1419 = vmatpush3.bf16.msra.mxu1 %v489_v49 }
  0x3d   : > { %691 = vmatmul.mubr.bf16.vlgmr.msra.gmra.mrb[0].mxu0 %v1477_v50  ;;  %755 = vmatmul.mubr.bf16.vlgmr.msra.gmra.mrb[0].mxu1 %v1480_v51  ;;  %v1846_v50 = vld [vmem:[%s1773_s14 + $0x68] sm:$0xff] }
  0x3e   : > { %698 = vmatprep.mubr.bf16.mxu0 %v1483_v52  ;;  %762 = vmatprep.mubr.bf16.mxu1 %v1485_v53  ;;  %v1849_v51 = vld [vmem:[%s1773_s14 + $0xe8] sm:$0xff]  ;;  %v1852_v52 = vld [vmem:[%s1773_s14 + $0x70] sm:$0xff] }
  0x45   : > { %699 = vmatmul.mubr.bf16.gmra.mrb[4].mxu0 %v1487_v54  ;;  %763 = vmatmul.mubr.bf16.gmra.mrb[4].mxu1 %v1488_v55  ;;  %v1861_v55 = vld [vmem:[%s1773_s14 + $0xf0] sm:$0xff] }
  0x46   : > { %706 = vmatprep.mubr.bf16.mxu0 %v1489_v56  ;;  %770 = vmatprep.mubr.bf16.mxu1 %v1491_v57  ;;  %v1864_v56 = vld [vmem:[%s1773_s14 + $0x78] sm:$0xff] }
  0x47   : > { %v1867_v57 = vld [vmem:[%s1773_s14 + $0xf8] sm:$0xff] }
  0x4d   : > { %707 = vmatmul.mubr.bf16.gmra.mrb[8].mxu0 %v1493_v58  ;;  %771 = vmatmul.mubr.bf16.gmra.mrb[8].mxu1 %v1494_v59 }
  0x4e   : > { %714 = vmatprep.mubr.bf16.mxu0 %v1495_v60  ;;  %778 = vmatprep.mubr.bf16.mxu1 %v1497_v61 }
  0x55   : > { %715 = vmatmul.mubr.bf16.gmra.mrb[12].mxu0 %v1499_v62  ;;  %779 = vmatmul.mubr.bf16.gmra.mrb[12].mxu1 %v1500_v63 }
  0x56   : > { %722 = vmatprep.mubr.bf16.mxu0 %v1501_v0  ;;  %786 = vmatprep.mubr.bf16.mxu1 %v1503_v1 }
  0x5d   : > { %723 = vmatmul.mubr.bf16.gmra.mrb[16].mxu0 %v1505_v2  ;;  %787 = vmatmul.mubr.bf16.gmra.mrb[16].mxu1 %v1506_v3 }
  0x5e   : > { %730 = vmatprep.mubr.bf16.mxu0 %v1507_v4  ;;  %794 = vmatprep.mubr.bf16.mxu1 %v1509_v5 }
  0x65   : > { %731 = vmatmul.mubr.bf16.gmra.mrb[20].mxu0 %v1511_v6  ;;  %795 = vmatmul.mubr.bf16.gmra.mrb[20].mxu1 %v1512_v7 }
  0x66   : > { %738 = vmatprep.mubr.bf16.mxu0 %v1513_v8  ;;  %802 = vmatprep.mubr.bf16.mxu1 %v1515_v9 }
  0x6d   : > { %739 = vmatmul.mubr.bf16.gmra.mrb[24].mxu0 %v1517_v10  ;;  %803 = vmatmul.mubr.bf16.gmra.mrb[24].mxu1 %v1518_v11 }
  0x6e   : > { %746 = vmatprep.mubr.bf16.mxu0 %v1519_v12  ;;  %810 = vmatprep.mubr.bf16.mxu1 %v1521_v13 }
  0x75   : > { %747 = vmatmul.mubr.bf16.gmra.mrb[28].mxu0 %v1523_v14  ;;  %811 = vmatmul.mubr.bf16.gmra.mrb[28].mxu1 %v1524_v15 }
 0x110   : > { %v1308_v16 = vpop.f32.mrb[0].mxu0  ;;  %v1356_v17 = vpop.f32.mrb[0].mxu1 }
 0x111   : > { %v1309_v20 = vpop.f32.mrb[1].mxu0  ;;  %v1357_v21 = vpop.f32.mrb[1].mxu1 }
 0x112   : > { %v1310_v46 = vadd.f32 %v1309_v20, %v1308_v16  ;;  %v1358_v47 = vadd.f32 %v1357_v21, %v1356_v17  ;;  %v1311_v48 = vpop.f32.mrb[2].mxu0  ;;  %v1359_v49 = vpop.f32.mrb[2].mxu1 }
 0x113   : > { %v1312_v53 = vpop.f32.mrb[3].mxu0  ;;  %v1360_v54 = vpop.f32.mrb[3].mxu1 }
 0x114   : > { %918 = vst [vmem:[%s1870_s29] sm:$0xff] %v1310_v46  ;;  %v982_v58 = vadd.f32 %v1310_v46, %v950_v18  ;;  %934 = vst [vmem:[%s1870_s29 + $0x80] sm:$0xff] %v1358_v47  ;;  %v998_v59 = vadd.f32 %v1358_v47, %v966_v19  ;;  %v1313_v60 = vadd.f32 %v1312_v53, %v1311_v48 }
 0x115   : > { %v1361_v61 = vadd.f32 %v1360_v54, %v1359_v49 }
 0x116   : > { %919 = vst [vmem:[%s1870_s29 + $0x8] sm:$0xff] %v1313_v60  ;;  %v983_v62 = vadd.f32 %v1313_v60, %v951_v22  ;;  %1014 = vst [vmem:[%s1858_s26] sm:$0xff] %v982_v58 }
 0x117   : > { %935 = vst [vmem:[%s1870_s29 + $0x88] sm:$0xff] %v1361_v61  ;;  %v999_v63 = vadd.f32 %v1361_v61, %v967_v23  ;;  %1030 = vst [vmem:[%s1858_s26 + $0x80] sm:$0xff] %v998_v59 }
 0x118   : > { %v1314_v0 = vpop.f32.mrb[4].mxu0  ;;  %v1362_v1 = vpop.f32.mrb[4].mxu1  ;;  %1015 = vst [vmem:[%s1858_s26 + $0x8] sm:$0xff] %v983_v62 }
 0x119   : > { %1031 = vst [vmem:[%s1858_s26 + $0x88] sm:$0xff] %v999_v63  ;;  %v1315_v2 = vpop.f32.mrb[5].mxu0  ;;  %v1363_v3 = vpop.f32.mrb[5].mxu1 }
 0x11a   : > { %v1316_v4 = vadd.f32 %v1315_v2, %v1314_v0  ;;  %v1364_v5 = vadd.f32 %v1363_v3, %v1362_v1  ;;  %v1317_v6 = vpop.f32.mrb[6].mxu0  ;;  %v1365_v7 = vpop.f32.mrb[6].mxu1 }
 0x11b   : > { %v1318_v8 = vpop.f32.mrb[7].mxu0  ;;  %v1366_v9 = vpop.f32.mrb[7].mxu1 }
 0x11c   : > { %920 = vst [vmem:[%s1870_s29 + $0x10] sm:$0xff] %v1316_v4  ;;  %v984_v10 = vadd.f32 %v1316_v4, %v952_v24  ;;  %936 = vst [vmem:[%s1870_s29 + $0x90] sm:$0xff] %v1364_v5  ;;  %v1000_v11 = vadd.f32 %v1364_v5, %v968_v25  ;;  %v1319_v12 = vadd.f32 %v1318_v8, %v1317_v6 }
 0x11d   : > { %v1367_v13 = vadd.f32 %v1366_v9, %v1365_v7 }
 0x11e   : > { %921 = vst [vmem:[%s1870_s29 + $0x18] sm:$0xff] %v1319_v12  ;;  %v985_v14 = vadd.f32 %v1319_v12, %v1786_v26  ;;  %1016 = vst [vmem:[%s1858_s26 + $0x10] sm:$0xff] %v984_v10 }
 0x11f   : > { %937 = vst [vmem:[%s1870_s29 + $0x98] sm:$0xff] %v1367_v13  ;;  %v1001_v15 = vadd.f32 %v1367_v13, %v1789_v27  ;;  %1032 = vst [vmem:[%s1858_s26 + $0x90] sm:$0xff] %v1000_v11 }
 0x120   : > { %v1320_v16 = vpop.f32.mrb[8].mxu0  ;;  %v1368_v17 = vpop.f32.mrb[8].mxu1  ;;  %1017 = vst [vmem:[%s1858_s26 + $0x18] sm:$0xff] %v985_v14 }
 0x121   : > { %1033 = vst [vmem:[%s1858_s26 + $0x98] sm:$0xff] %v1001_v15  ;;  %v1321_v18 = vpop.f32.mrb[9].mxu0  ;;  %v1369_v19 = vpop.f32.mrb[9].mxu1 }
 0x122   : > { %v1322_v20 = vadd.f32 %v1321_v18, %v1320_v16  ;;  %v1370_v21 = vadd.f32 %v1369_v19, %v1368_v17  ;;  %v1323_v22 = vpop.f32.mrb[10].mxu0  ;;  %v1371_v23 = vpop.f32.mrb[10].mxu1 }
 0x123   : > { %v1324_v24 = vpop.f32.mrb[11].mxu0  ;;  %v1372_v25 = vpop.f32.mrb[11].mxu1 }
 0x124   : > { %922 = vst [vmem:[%s1870_s29 + $0x20] sm:$0xff] %v1322_v20  ;;  %v986_v26 = vadd.f32 %v1322_v20, %v1792_v28  ;;  %938 = vst [vmem:[%s1870_s29 + $0xa0] sm:$0xff] %v1370_v21  ;;  %v1002_v27 = vadd.f32 %v1370_v21, %v1795_v29  ;;  %v1325_v46 = vadd.f32 %v1324_v24, %v1323_v22 }
 0x125   : > { %v1373_v47 = vadd.f32 %v1372_v25, %v1371_v23 }
 0x126   : > { %923 = vst [vmem:[%s1870_s29 + $0x28] sm:$0xff] %v1325_v46  ;;  %v987_v48 = vadd.f32 %v1325_v46, %v1798_v30  ;;  %1018 = vst [vmem:[%s1858_s26 + $0x20] sm:$0xff] %v986_v26 }
 0x127   : > { %939 = vst [vmem:[%s1870_s29 + $0xa8] sm:$0xff] %v1373_v47  ;;  %v1003_v49 = vadd.f32 %v1373_v47, %v1801_v31  ;;  %1034 = vst [vmem:[%s1858_s26 + $0xa0] sm:$0xff] %v1002_v27 }
 0x128   : > { %v1326_v53 = vpop.f32.mrb[12].mxu0  ;;  %v1374_v54 = vpop.f32.mrb[12].mxu1  ;;  %1019 = vst [vmem:[%s1858_s26 + $0x28] sm:$0xff] %v987_v48 }
 0x129   : > { %1035 = vst [vmem:[%s1858_s26 + $0xa8] sm:$0xff] %v1003_v49  ;;  %v1327_v28 = vpop.f32.mrb[13].mxu0  ;;  %v1375_v29 = vpop.f32.mrb[13].mxu1 }
 0x12a   : > { %v1328_v58 = vadd.f32 %v1327_v28, %v1326_v53  ;;  %v1376_v59 = vadd.f32 %v1375_v29, %v1374_v54  ;;  %v1329_v30 = vpop.f32.mrb[14].mxu0  ;;  %v1377_v60 = vpop.f32.mrb[14].mxu1 }
 0x12b   : > { %v1330_v61 = vpop.f32.mrb[15].mxu0  ;;  %v1378_v31 = vpop.f32.mrb[15].mxu1 }
 0x12c   : > { %924 = vst [vmem:[%s1870_s29 + $0x30] sm:$0xff] %v1328_v58  ;;  %v988_v62 = vadd.f32 %v1328_v58, %v1804_v32  ;;  %940 = vst [vmem:[%s1870_s29 + $0xb0] sm:$0xff] %v1376_v59  ;;  %v1004_v63 = vadd.f32 %v1376_v59, %v1807_v33  ;;  %v1331_v0 = vadd.f32 %v1330_v61, %v1329_v30 }
 0x12d   : > { %v1379_v1 = vadd.f32 %v1378_v31, %v1377_v60 }
 0x12e   : > { %925 = vst [vmem:[%s1870_s29 + $0x38] sm:$0xff] %v1331_v0  ;;  %v989_v2 = vadd.f32 %v1331_v0, %v1810_v34  ;;  %1020 = vst [vmem:[%s1858_s26 + $0x30] sm:$0xff] %v988_v62 }
 0x12f   : > { %941 = vst [vmem:[%s1870_s29 + $0xb8] sm:$0xff] %v1379_v1  ;;  %v1005_v3 = vadd.f32 %v1379_v1, %v1813_v35  ;;  %1036 = vst [vmem:[%s1858_s26 + $0xb0] sm:$0xff] %v1004_v63 }
 0x130   : > { %v1332_v4 = vpop.f32.mrb[16].mxu0  ;;  %v1380_v5 = vpop.f32.mrb[16].mxu1  ;;  %1021 = vst [vmem:[%s1858_s26 + $0x38] sm:$0xff] %v989_v2 }
 0x131   : > { %1037 = vst [vmem:[%s1858_s26 + $0xb8] sm:$0xff] %v1005_v3  ;;  %v1333_v32 = vpop.f32.mrb[17].mxu0  ;;  %v1381_v33 = vpop.f32.mrb[17].mxu1 }
 0x132   : > { %v1334_v6 = vadd.f32 %v1333_v32, %v1332_v4  ;;  %v1382_v7 = vadd.f32 %v1381_v33, %v1380_v5  ;;  %v1335_v34 = vpop.f32.mrb[18].mxu0  ;;  %v1383_v8 = vpop.f32.mrb[18].mxu1 }
 0x133   : > { %v1336_v9 = vpop.f32.mrb[19].mxu0  ;;  %v1384_v35 = vpop.f32.mrb[19].mxu1 }
 0x134   : > { %926 = vst [vmem:[%s1870_s29 + $0x40] sm:$0xff] %v1334_v6  ;;  %v990_v10 = vadd.f32 %v1334_v6, %v1816_v36  ;;  %942 = vst [vmem:[%s1870_s29 + $0xc0] sm:$0xff] %v1382_v7  ;;  %v1006_v11 = vadd.f32 %v1382_v7, %v1819_v37  ;;  %v1337_v12 = vadd.f32 %v1336_v9, %v1335_v34 }
 0x135   : > { %v1385_v13 = vadd.f32 %v1384_v35, %v1383_v8 }
 0x136   : > { %927 = vst [vmem:[%s1870_s29 + $0x48] sm:$0xff] %v1337_v12  ;;  %v991_v14 = vadd.f32 %v1337_v12, %v1822_v38  ;;  %1022 = vst [vmem:[%s1858_s26 + $0x40] sm:$0xff] %v990_v10 }
 0x137   : > { %943 = vst [vmem:[%s1870_s29 + $0xc8] sm:$0xff] %v1385_v13  ;;  %v1007_v15 = vadd.f32 %v1385_v13, %v1825_v39  ;;  %1038 = vst [vmem:[%s1858_s26 + $0xc0] sm:$0xff] %v1006_v11 }
 0x138   : > { %v1338_v16 = vpop.f32.mrb[20].mxu0  ;;  %v1386_v17 = vpop.f32.mrb[20].mxu1  ;;  %1023 = vst [vmem:[%s1858_s26 + $0x48] sm:$0xff] %v991_v14 }
 0x139   : > { %1039 = vst [vmem:[%s1858_s26 + $0xc8] sm:$0xff] %v1007_v15  ;;  %v1339_v36 = vpop.f32.mrb[21].mxu0  ;;  %v1387_v37 = vpop.f32.mrb[21].mxu1 }
 0x13a   : > { %v1340_v18 = vadd.f32 %v1339_v36, %v1338_v16  ;;  %v1388_v19 = vadd.f32 %v1387_v37, %v1386_v17  ;;  %v1341_v38 = vpop.f32.mrb[22].mxu0  ;;  %v1389_v20 = vpop.f32.mrb[22].mxu1 }
 0x13b   : > { %v1342_v21 = vpop.f32.mrb[23].mxu0  ;;  %v1390_v39 = vpop.f32.mrb[23].mxu1 }
 0x13c   : > { %928 = vst [vmem:[%s1870_s29 + $0x50] sm:$0xff] %v1340_v18  ;;  %v992_v22 = vadd.f32 %v1340_v18, %v1828_v40  ;;  %944 = vst [vmem:[%s1870_s29 + $0xd0] sm:$0xff] %v1388_v19  ;;  %v1008_v23 = vadd.f32 %v1388_v19, %v1831_v41  ;;  %v1343_v24 = vadd.f32 %v1342_v21, %v1341_v38 }
 0x13d   : > { %v1391_v25 = vadd.f32 %v1390_v39, %v1389_v20 }
 0x13e   : > { %929 = vst [vmem:[%s1870_s29 + $0x58] sm:$0xff] %v1343_v24  ;;  %v993_v26 = vadd.f32 %v1343_v24, %v1834_v42  ;;  %1024 = vst [vmem:[%s1858_s26 + $0x50] sm:$0xff] %v992_v22 }
 0x13f   : > { %945 = vst [vmem:[%s1870_s29 + $0xd8] sm:$0xff] %v1391_v25  ;;  %v1009_v27 = vadd.f32 %v1391_v25, %v1837_v43  ;;  %1040 = vst [vmem:[%s1858_s26 + $0xd0] sm:$0xff] %v1008_v23 }
 0x140   : > { %v1344_v46 = vpop.f32.mrb[24].mxu0  ;;  %v1392_v47 = vpop.f32.mrb[24].mxu1  ;;  %1025 = vst [vmem:[%s1858_s26 + $0x58] sm:$0xff] %v993_v26 }
 0x141   : > { %1041 = vst [vmem:[%s1858_s26 + $0xd8] sm:$0xff] %v1009_v27  ;;  %v1345_v40 = vpop.f32.mrb[25].mxu0  ;;  %v1393_v41 = vpop.f32.mrb[25].mxu1 }
 0x142   : > { %v1346_v48 = vadd.f32 %v1345_v40, %v1344_v46  ;;  %v1394_v49 = vadd.f32 %v1393_v41, %v1392_v47  ;;  %v1347_v42 = vpop.f32.mrb[26].mxu0  ;;  %v1395_v53 = vpop.f32.mrb[26].mxu1 }
 0x143   : > { %v1348_v54 = vpop.f32.mrb[27].mxu0  ;;  %v1396_v43 = vpop.f32.mrb[27].mxu1 }
 0x144   : > { %930 = vst [vmem:[%s1870_s29 + $0x60] sm:$0xff] %v1346_v48  ;;  %v994_v28 = vadd.f32 %v1346_v48, %v1840_v44  ;;  %946 = vst [vmem:[%s1870_s29 + $0xe0] sm:$0xff] %v1394_v49  ;;  %v1010_v29 = vadd.f32 %v1394_v49, %v1843_v45  ;;  %v1349_v58 = vadd.f32 %v1348_v54, %v1347_v42 }
 0x145   : > { %v1397_v59 = vadd.f32 %v1396_v43, %v1395_v53 }
 0x146   : > { %931 = vst [vmem:[%s1870_s29 + $0x68] sm:$0xff] %v1349_v58  ;;  %v995_v30 = vadd.f32 %v1349_v58, %v1846_v50  ;;  %1026 = vst [vmem:[%s1858_s26 + $0x60] sm:$0xff] %v994_v28 }
 0x147   : > { %947 = vst [vmem:[%s1870_s29 + $0xe8] sm:$0xff] %v1397_v59  ;;  %v1011_v60 = vadd.f32 %v1397_v59, %v1849_v51  ;;  %1042 = vst [vmem:[%s1858_s26 + $0xe0] sm:$0xff] %v1010_v29 }
 0x148   : > { %v1350_v61 = vpop.f32.mrb[28].mxu0  ;;  %v1398_v31 = vpop.f32.mrb[28].mxu1  ;;  %1027 = vst [vmem:[%s1858_s26 + $0x68] sm:$0xff] %v995_v30 }
 0x149   : > { %1043 = vst [vmem:[%s1858_s26 + $0xe8] sm:$0xff] %v1011_v60  ;;  %v1351_v44 = vpop.f32.mrb[29].mxu0  ;;  %v1399_v45 = vpop.f32.mrb[29].mxu1 }
 0x14a   : > { %v1352_v62 = vadd.f32 %v1351_v44, %v1350_v61  ;;  %v1400_v63 = vadd.f32 %v1399_v45, %v1398_v31  ;;  %v1353_v50 = vpop.f32.mrb[30].mxu0  ;;  %v1401_v0 = vpop.f32.mrb[30].mxu1 }
 0x14b   : > { %v1354_v51 = vpop.f32.mrb[31].mxu0  ;;  %v1402_v1 = vpop.f32.mrb[31].mxu1 }
 0x14c   : > { %932 = vst [vmem:[%s1870_s29 + $0x70] sm:$0xff] %v1352_v62  ;;  %v996_v2 = vadd.f32 %v1352_v62, %v1852_v52  ;;  %948 = vst [vmem:[%s1870_s29 + $0xf0] sm:$0xff] %v1400_v63  ;;  %v1012_v3 = vadd.f32 %v1400_v63, %v1861_v55  ;;  %v1355_v4 = vadd.f32 %v1354_v51, %v1353_v50 }
 0x14d   : > { %v1403_v5 = vadd.f32 %v1402_v1, %v1401_v0 }
 0x14e   : > { %933 = vst [vmem:[%s1870_s29 + $0x78] sm:$0xff] %v1355_v4  ;;  %v997_v32 = vadd.f32 %v1355_v4, %v1864_v56  ;;  %1028 = vst [vmem:[%s1858_s26 + $0x70] sm:$0xff] %v996_v2 }
 0x14f   : > { %949 = vst [vmem:[%s1870_s29 + $0xf8] sm:$0xff] %v1403_v5  ;;  %v1013_v33 = vadd.f32 %v1403_v5, %v1867_v57  ;;  %1044 = vst [vmem:[%s1858_s26 + $0xf0] sm:$0xff] %v1012_v3 }
 0x150   : > { %1538 = shalt.err (!%p1535_p5)
}
 0x151   : > { %s1539_s11 = scalar_lea.hbm %s1955_s8, 4096  ;;  %s1543_s22 = scalar_lea.hbm %s2022_s3, 12288 }
 0x152   : > { %p1540_p6 = scmp.ne.s32.totalorder %s1955_s8, %s1539_s11  ;;  %p1544_p10 = scmp.lt.u32.totalorder %s1955_s8, %s2022_s3 }
 0x153   : > { %p1545_p11 = scmp.lt.u32.totalorder %s1543_s22, %s1539_s11  ;;  %p1547_p13 = scmp.lt.u32.totalorder %s1539_s11, %s1955_s8 }
 0x154   : > { %p1541_p7 = pnand %p1540_p6, %p1673_p4 }
 0x155   : > { %p1546_p12 = por %p1545_p11, %p1544_p10 }
 0x156   : > { %p1542_p9 = pneg %p1541_p7 }
 0x157   : > { %p1548_p0 = por %p1547_p13, %p1546_p12 }
 0x159   : > { %p1549_p1 = pnand %p1548_p0, %p1542_p9 }
 0x15b   : > { %1552 = shalt.err (!%p1549_p1)
}
 0x15c   : > { %s1606_s30 = smov 128   ;;  %s1607_s6 = smov 8   ;;  %1029 = vst [vmem:[%s1858_s26 + $0x78] sm:$0xff] %v997_v32  ;;  %1045 = vst [vmem:[%s1858_s26 + $0xf8] sm:$0xff] %v1013_v33 }
 0x15d   : > { %1420 = dma.vmem_to_hbm [thread:$0]  (%p1673_p4), %s1957_s5, 4096, %s1955_s8, %s1971_s18, %s1606_s30, %s1606_s30, %s1607_s6  }
 0x15e PF: > { %p1426_p2 = scmp.ge.s32.totalorder %s1603_s20, 2  ;;  %s1090_s7 = sand.u32 1, %s1583_s15  }
 0x15f   : > { %s1091_s9 = scalar_lea.sflag [#allocation4], %s1090_s7 }
 0x160   : > { %p1423_p3 = pnand %p1426_p2, %p1680_p8 }
 0x162   : > { %1578 = dma.done.wait (!%p1423_p3), %s1091_s9, 4096  }
 0x163   : > { %1580 = vsyncadd (!%p1423_p3), %s1091_s9, 4294963200  ;;  %s18_s20 = sadd.s32 1, %s1603_s20   ;;  %s2026_s15 = smov %s1587_s16 }
 0x164   : > { %p15_p5 = scmp.ge.s32.totalorder %s18_s20, 5   ;;  %s2027_s16 = smov %s1591_s17 }
 0x165   : > { %s2028_s17 = smov %s1686_s28  ;;  %s2029_s18 = smov %s1599_s19 }
 0x166   : > { %s2030_s19 = smov %s2032_s23  ;;  %17 = sbr.rel (!%p15_p5) target bundleno = 4 (0x4), region = 93 }
 0x16d   :  { %1108 = vsyncpa [#allocation4], 1 }
 0x16e   :  { %1110 = vsyncpa [#allocation4 + $0x1], 1 }

// kernel: lightgcn_ssl_forward.2
= control target key start
LH: loop header
LB: loop body
LE: loop exit
PB: predicated region body
PF: predicated region fallthrough
CT: control target
= control target key end

     0   :  { %s1541_s15 = smov 0   ;;  %s1543_s16 = smov 0   ;;  %s1838_s0 = inlined_call_operand.vmem [shape: bf16[3,256,256], index: 0, kind: input, shape index: {}]   ;;  %s1839_s1 = inlined_call_operand.vmem [shape: f32[3,256,128], index: 1, kind: input, shape index: {}]   ;;  %s1840_s2 = inlined_call_operand.vmem [shape: f32[3,256,128], index: 2, kind: input, shape index: {}, may-alias: {2,4}]   ;;  %s1841_s3 = inlined_call_operand.vmem [shape: f32[3,256,128], index: 3, kind: output, shape index: {0}]   ;;  %s1842_s4 = inlined_call_operand.vmem [shape: f32[3,256,128], index: 4, kind: output, shape index: {1}, may-alias: {2,4}]  }
   0x1   :  { %s1545_s17 = smov 0  }
   0x2 LB: > { %s30_s18 = sadd.s32 1, %s1510_s16  ;;  %p1242_p0 = scmp.ge.s32.totalorder %s1514_s17, 1  ;;  %s1514_s17 = sphi %s1545_s17, %s15_s17   ;;  %s1510_s16 = sphi %s1543_s16, %s1844_s16   ;;  %s1506_s15 = sphi %s1541_s15, %s1843_s15  }
   0x3   : > { %p32_p1 = scmp.ge.s32.totalorder %s30_s18, 3  ;;  %p237_p2 = scmp.lt.s32.totalorder %s1514_s17, 4 }
   0x5   : > { %s1846_s18 = smov (%p32_p1, %s30_s18), 0  ;;  %p238_p3 = pnand %p1242_p0, %p237_p2 }
   0x6   : > { %p305_p4 = scmp.lt.s32.totalorder (!%p238_p3), %s1506_s15, 2 }
   0x7   : > { %241 = sbr.rel (%p238_p3) target bundleno = 329 (0x149), region = 32 }
   0xe   : > { %s1848_s15 = smov (!%p305_p4, %s1506_s15), 2 }
   0xf   : > { %s1559_s19 = sshll.u32 %s1848_s15, 8 }
  0x10   : > { %s1565_s22 = scalar_lea.vmem %s1839_s1, %s1559_s19  ;;  %s1585_s25 = scalar_lea.vmem %s1838_s0, %s1559_s19 }
  0x11   : > { %v476_v0 = vld [vmem:[%s1565_s22 + $0x80] sm:$0xff]  ;;  %v477_v1 = vld [vmem:[%s1565_s22 + $0x88] sm:$0xff]  ;;  %v478_v5 = vld [vmem:[%s1565_s22 + $0x90] sm:$0xff]  ;;  %s1641_s28 = scalar_lea.vmem %s1840_s2, %s1559_s19  ;;  %s1649_s5 = scalar_lea.vmem %s1841_s3, %s1559_s19 }
  0x12   : > { %v460_v2 = vld [vmem:[%s1565_s22] sm:$0xff]  ;;  %v500_v3 = vpack.c.bf16 %v477_v1, %v476_v0  ;;  %v461_v4 = vld [vmem:[%s1565_s22 + $0x8] sm:$0xff]  ;;  %v479_v6 = vld [vmem:[%s1565_s22 + $0x98] sm:$0xff]  ;;  %s1728_s8 = scalar_lea.vmem %s1842_s4, %s1559_s19 }
  0x13   : > { %v492_v7 = vpack.c.bf16 %v461_v4, %v460_v2  ;;  %v501_v8 = vpack.c.bf16 %v479_v6, %v478_v5  ;;  %v462_v9 = vld [vmem:[%s1565_s22 + $0x10] sm:$0xff]  ;;  %v463_v10 = vld [vmem:[%s1565_s22 + $0x18] sm:$0xff]  ;;  %v480_v11 = vld [vmem:[%s1565_s22 + $0xa0] sm:$0xff] }
  0x14   : > { %1292 = vmatprep.subr.bf16.mxu0 %v500_v3  ;;  %1404 = vmatprep.subr.bf16.mxu1 %v500_v3  ;;  %v481_v12 = vld [vmem:[%s1565_s22 + $0xa8] sm:$0xff]  ;;  %v493_v13 = vpack.c.bf16 %v463_v10, %v462_v9  ;;  %v464_v15 = vld [vmem:[%s1565_s22 + $0x20] sm:$0xff]  ;;  %v482_v17 = vld [vmem:[%s1565_s22 + $0xb0] sm:$0xff] }
  0x15   : > { %1293 = vmatpush3.bf16.msra.mxu0 %v492_v7  ;;  %1412 = vmatpush3.bf16.msra.mxu1 %v492_v7  ;;  %v502_v14 = vpack.c.bf16 %v481_v12, %v480_v11  ;;  %v465_v16 = vld [vmem:[%s1565_s22 + $0x28] sm:$0xff]  ;;  %v483_v18 = vld [vmem:[%s1565_s22 + $0xb8] sm:$0xff]  ;;  %v466_v21 = vld [vmem:[%s1565_s22 + $0x30] sm:$0xff] }
  0x16   : > { %1294 = vmatprep.subr.bf16.mxu0 %v501_v8  ;;  %1405 = vmatprep.subr.bf16.mxu1 %v501_v8  ;;  %v494_v19 = vpack.c.bf16 %v465_v16, %v464_v15  ;;  %v503_v20 = vpack.c.bf16 %v483_v18, %v482_v17  ;;  %v467_v22 = vld [vmem:[%s1565_s22 + $0x38] sm:$0xff]  ;;  %v484_v23 = vld [vmem:[%s1565_s22 + $0xc0] sm:$0xff]  ;;  %v485_v24 = vld [vmem:[%s1565_s22 + $0xc8] sm:$0xff] }
  0x17   : > { %v468_v25 = vld [vmem:[%s1565_s22 + $0x40] sm:$0xff]  ;;  %v469_v26 = vld [vmem:[%s1565_s22 + $0x48] sm:$0xff]  ;;  %v495_v28 = vpack.c.bf16 %v467_v22, %v466_v21  ;;  %v486_v29 = vld [vmem:[%s1565_s22 + $0xd0] sm:$0xff]  ;;  %v504_v30 = vpack.c.bf16 %v485_v24, %v484_v23 }
  0x18   : > { %v1446_v27 = vld [vmem:[%s1585_s25 + $0x4] ss:$8 sps:$4 sm:$0xff]   ;;  %v487_v32 = vld [vmem:[%s1565_s22 + $0xd8] sm:$0xff]  ;;  %v496_v33 = vpack.c.bf16 %v469_v26, %v468_v25  ;;  %v470_v34 = vld [vmem:[%s1565_s22 + $0x50] sm:$0xff] }
  0x19   : > { %1295 = vmatpush3.bf16.msra.mxu0 %v493_v13  ;;  %1413 = vmatpush3.bf16.msra.mxu1 %v493_v13  ;;  %v1449_v31 = vld [vmem:[%s1585_s25 + $0x84] ss:$8 sps:$4 sm:$0xff]   ;;  %v505_v35 = vpack.c.bf16 %v487_v32, %v486_v29  ;;  %v471_v36 = vld [vmem:[%s1565_s22 + $0x58] sm:$0xff]  ;;  %v490_v43 = vld [vmem:[%s1565_s22 + $0xf0] sm:$0xff] }
  0x1a   : > { %1296 = vmatprep.subr.bf16.mxu0 %v502_v14  ;;  %1406 = vmatprep.subr.bf16.mxu1 %v502_v14  ;;  %v488_v37 = vld [vmem:[%s1565_s22 + $0xe0] sm:$0xff]  ;;  %v489_v38 = vld [vmem:[%s1565_s22 + $0xe8] sm:$0xff]  ;;  %v497_v39 = vpack.c.bf16 %v471_v36, %v470_v34  ;;  %v491_v44 = vld [vmem:[%s1565_s22 + $0xf8] sm:$0xff] }
  0x1b   : > { %700 = vmatprep.mubr.bf16.mxu0 %v1446_v27  ;;  %764 = vmatprep.mubr.bf16.mxu1 %v1449_v31  ;;  %v472_v40 = vld [vmem:[%s1565_s22 + $0x60] sm:$0xff]  ;;  %v473_v41 = vld [vmem:[%s1565_s22 + $0x68] sm:$0xff]  ;;  %v506_v42 = vpack.c.bf16 %v489_v38, %v488_v37  ;;  %v474_v46 = vld [vmem:[%s1565_s22 + $0x70] sm:$0xff]  ;;  %v507_v47 = vpack.c.bf16 %v491_v44, %v490_v43 }
  0x1c   : > { %v498_v45 = vpack.c.bf16 %v473_v41, %v472_v40  ;;  %v475_v48 = vld [vmem:[%s1565_s22 + $0x78] sm:$0xff]  ;;  %v1444_v50 = vld [vmem:[%s1585_s25] ss:$8 sps:$4 sm:$0xff]   ;;  %v1456_v56 = vld [vmem:[%s1585_s25 + $0x24] ss:$8 sps:$4 sm:$0xff]  }
  0x1d   : > { %1297 = vmatpush3.bf16.msra.mxu0 %v494_v19  ;;  %1414 = vmatpush3.bf16.msra.mxu1 %v494_v19  ;;  %v499_v49 = vpack.c.bf16 %v475_v48, %v474_v46  ;;  %v1447_v51 = vld [vmem:[%s1585_s25 + $0x80] ss:$8 sps:$4 sm:$0xff]   ;;  %v1450_v52 = vld [vmem:[%s1585_s25 + $0x14] ss:$8 sps:$4 sm:$0xff]   ;;  %v1454_v54 = vld [vmem:[%s1585_s25 + $0x10] ss:$8 sps:$4 sm:$0xff]  }
  0x1e   : > { %1298 = vmatprep.subr.bf16.mxu0 %v503_v20  ;;  %1407 = vmatprep.subr.bf16.mxu1 %v503_v20  ;;  %v1452_v53 = vld [vmem:[%s1585_s25 + $0x94] ss:$8 sps:$4 sm:$0xff]   ;;  %v1455_v55 = vld [vmem:[%s1585_s25 + $0x90] ss:$8 sps:$4 sm:$0xff]   ;;  %v1458_v57 = vld [vmem:[%s1585_s25 + $0xa4] ss:$8 sps:$4 sm:$0xff]  }
  0x1f   : > { %v1460_v58 = vld [vmem:[%s1585_s25 + $0x20] ss:$8 sps:$4 sm:$0xff]   ;;  %v1462_v60 = vld [vmem:[%s1585_s25 + $0x34] ss:$8 sps:$4 sm:$0xff]   ;;  %v1466_v62 = vld [vmem:[%s1585_s25 + $0x30] ss:$8 sps:$4 sm:$0xff]  }
  0x20   : > { %v1461_v59 = vld [vmem:[%s1585_s25 + $0xa0] ss:$8 sps:$4 sm:$0xff]   ;;  %v1464_v61 = vld [vmem:[%s1585_s25 + $0xb4] ss:$8 sps:$4 sm:$0xff]   ;;  %v1467_v63 = vld [vmem:[%s1585_s25 + $0xb0] ss:$8 sps:$4 sm:$0xff]  }
  0x21   : > { %1299 = vmatpush3.bf16.msra.mxu0 %v495_v28  ;;  %1415 = vmatpush3.bf16.msra.mxu1 %v495_v28  ;;  %v1468_v0 = vld [vmem:[%s1585_s25 + $0x44] ss:$8 sps:$4 sm:$0xff]   ;;  %v1472_v2 = vld [vmem:[%s1585_s25 + $0x40] ss:$8 sps:$4 sm:$0xff]   ;;  %v1474_v4 = vld [vmem:[%s1585_s25 + $0x54] ss:$8 sps:$4 sm:$0xff]  }
  0x22   : > { %1300 = vmatprep.subr.bf16.mxu0 %v504_v30  ;;  %1408 = vmatprep.subr.bf16.mxu1 %v504_v30  ;;  %v1470_v1 = vld [vmem:[%s1585_s25 + $0xc4] ss:$8 sps:$4 sm:$0xff]   ;;  %v1473_v3 = vld [vmem:[%s1585_s25 + $0xc0] ss:$8 sps:$4 sm:$0xff]   ;;  %v1476_v5 = vld [vmem:[%s1585_s25 + $0xd4] ss:$8 sps:$4 sm:$0xff]  }
  0x23   : > { %v1478_v6 = vld [vmem:[%s1585_s25 + $0x50] ss:$8 sps:$4 sm:$0xff]   ;;  %v1480_v8 = vld [vmem:[%s1585_s25 + $0x64] ss:$8 sps:$4 sm:$0xff]   ;;  %v1484_v10 = vld [vmem:[%s1585_s25 + $0x60] ss:$8 sps:$4 sm:$0xff]  }
  0x24   : > { %v1479_v7 = vld [vmem:[%s1585_s25 + $0xd0] ss:$8 sps:$4 sm:$0xff]   ;;  %v1482_v9 = vld [vmem:[%s1585_s25 + $0xe4] ss:$8 sps:$4 sm:$0xff]   ;;  %v1485_v11 = vld [vmem:[%s1585_s25 + $0xe0] ss:$8 sps:$4 sm:$0xff]  }
  0x25   : > { %1301 = vmatpush3.bf16.msra.mxu0 %v496_v33  ;;  %1416 = vmatpush3.bf16.msra.mxu1 %v496_v33  ;;  %v1486_v12 = vld [vmem:[%s1585_s25 + $0x74] ss:$8 sps:$4 sm:$0xff]   ;;  %v1490_v14 = vld [vmem:[%s1585_s25 + $0x70] ss:$8 sps:$4 sm:$0xff]   ;;  %v960_v18 = vld [vmem:[%s1641_s28] sm:$0xff] }
  0x26   : > { %1302 = vmatprep.subr.bf16.mxu0 %v505_v35  ;;  %1409 = vmatprep.subr.bf16.mxu1 %v505_v35  ;;  %v1488_v13 = vld [vmem:[%s1585_s25 + $0xf4] ss:$8 sps:$4 sm:$0xff]   ;;  %v1491_v15 = vld [vmem:[%s1585_s25 + $0xf0] ss:$8 sps:$4 sm:$0xff]   ;;  %v976_v19 = vld [vmem:[%s1641_s28 + $0x80] sm:$0xff] }
  0x27   : > { %v961_v22 = vld [vmem:[%s1641_s28 + $0x8] sm:$0xff]  ;;  %v962_v24 = vld [vmem:[%s1641_s28 + $0x10] sm:$0xff]  ;;  %v1656_v26 = vld [vmem:[%s1641_s28 + $0x18] sm:$0xff] }
  0x28   : > { %v977_v23 = vld [vmem:[%s1641_s28 + $0x88] sm:$0xff]  ;;  %v978_v25 = vld [vmem:[%s1641_s28 + $0x90] sm:$0xff]  ;;  %v1659_v27 = vld [vmem:[%s1641_s28 + $0x98] sm:$0xff] }
  0x29   : > { %1303 = vmatpush3.bf16.msra.mxu0 %v497_v39  ;;  %1417 = vmatpush3.bf16.msra.mxu1 %v497_v39  ;;  %v1662_v28 = vld [vmem:[%s1641_s28 + $0x20] sm:$0xff]  ;;  %v1668_v30 = vld [vmem:[%s1641_s28 + $0x28] sm:$0xff]  ;;  %v1674_v32 = vld [vmem:[%s1641_s28 + $0x30] sm:$0xff] }
  0x2a   : > { %1304 = vmatprep.subr.bf16.mxu0 %v506_v42  ;;  %1410 = vmatprep.subr.bf16.mxu1 %v506_v42  ;;  %v1665_v29 = vld [vmem:[%s1641_s28 + $0xa0] sm:$0xff]  ;;  %v1671_v31 = vld [vmem:[%s1641_s28 + $0xa8] sm:$0xff]  ;;  %v1677_v33 = vld [vmem:[%s1641_s28 + $0xb0] sm:$0xff] }
  0x2b   : > { %v1680_v34 = vld [vmem:[%s1641_s28 + $0x38] sm:$0xff]  ;;  %v1686_v36 = vld [vmem:[%s1641_s28 + $0x40] sm:$0xff]  ;;  %v1692_v38 = vld [vmem:[%s1641_s28 + $0x48] sm:$0xff] }
  0x2c   : > { %v1683_v35 = vld [vmem:[%s1641_s28 + $0xb8] sm:$0xff]  ;;  %v1689_v37 = vld [vmem:[%s1641_s28 + $0xc0] sm:$0xff]  ;;  %v1695_v39 = vld [vmem:[%s1641_s28 + $0xc8] sm:$0xff] }
  0x2d   : > { %1305 = vmatpush3.bf16.msra.mxu0 %v498_v45  ;;  %1418 = vmatpush3.bf16.msra.mxu1 %v498_v45  ;;  %v1698_v40 = vld [vmem:[%s1641_s28 + $0x50] sm:$0xff]  ;;  %v1704_v42 = vld [vmem:[%s1641_s28 + $0x58] sm:$0xff]  ;;  %v1710_v44 = vld [vmem:[%s1641_s28 + $0x60] sm:$0xff] }
  0x2e   : > { %1306 = vmatprep.subr.bf16.mxu0 %v507_v47  ;;  %1411 = vmatprep.subr.bf16.mxu1 %v507_v47  ;;  %v1701_v41 = vld [vmem:[%s1641_s28 + $0xd0] sm:$0xff]  ;;  %v1707_v43 = vld [vmem:[%s1641_s28 + $0xd8] sm:$0xff]  ;;  %v1713_v45 = vld [vmem:[%s1641_s28 + $0xe0] sm:$0xff] }
  0x31   : > { %1307 = vmatpush3.bf16.msra.mxu0 %v499_v49  ;;  %1419 = vmatpush3.bf16.msra.mxu1 %v499_v49 }
  0x34   : > { %701 = vmatmul.mubr.bf16.vlgmr.msra.gmra.mrb[0].mxu0 %v1444_v50  ;;  %765 = vmatmul.mubr.bf16.vlgmr.msra.gmra.mrb[0].mxu1 %v1447_v51  ;;  %v1716_v50 = vld [vmem:[%s1641_s28 + $0x68] sm:$0xff] }
  0x35   : > { %708 = vmatprep.mubr.bf16.mxu0 %v1450_v52  ;;  %772 = vmatprep.mubr.bf16.mxu1 %v1452_v53  ;;  %v1719_v51 = vld [vmem:[%s1641_s28 + $0xe8] sm:$0xff]  ;;  %v1722_v52 = vld [vmem:[%s1641_s28 + $0x70] sm:$0xff] }
  0x3c   : > { %709 = vmatmul.mubr.bf16.gmra.mrb[4].mxu0 %v1454_v54  ;;  %773 = vmatmul.mubr.bf16.gmra.mrb[4].mxu1 %v1455_v55  ;;  %v1731_v55 = vld [vmem:[%s1641_s28 + $0xf0] sm:$0xff] }
  0x3d   : > { %716 = vmatprep.mubr.bf16.mxu0 %v1456_v56  ;;  %780 = vmatprep.mubr.bf16.mxu1 %v1458_v57  ;;  %v1734_v56 = vld [vmem:[%s1641_s28 + $0x78] sm:$0xff] }
  0x3e   : > { %v1737_v57 = vld [vmem:[%s1641_s28 + $0xf8] sm:$0xff] }
  0x44   : > { %717 = vmatmul.mubr.bf16.gmra.mrb[8].mxu0 %v1460_v58  ;;  %781 = vmatmul.mubr.bf16.gmra.mrb[8].mxu1 %v1461_v59 }
  0x45   : > { %724 = vmatprep.mubr.bf16.mxu0 %v1462_v60  ;;  %788 = vmatprep.mubr.bf16.mxu1 %v1464_v61 }
  0x4c   : > { %725 = vmatmul.mubr.bf16.gmra.mrb[12].mxu0 %v1466_v62  ;;  %789 = vmatmul.mubr.bf16.gmra.mrb[12].mxu1 %v1467_v63 }
  0x4d   : > { %732 = vmatprep.mubr.bf16.mxu0 %v1468_v0  ;;  %796 = vmatprep.mubr.bf16.mxu1 %v1470_v1 }
  0x54   : > { %733 = vmatmul.mubr.bf16.gmra.mrb[16].mxu0 %v1472_v2  ;;  %797 = vmatmul.mubr.bf16.gmra.mrb[16].mxu1 %v1473_v3 }
  0x55   : > { %740 = vmatprep.mubr.bf16.mxu0 %v1474_v4  ;;  %804 = vmatprep.mubr.bf16.mxu1 %v1476_v5 }
  0x5c   : > { %741 = vmatmul.mubr.bf16.gmra.mrb[20].mxu0 %v1478_v6  ;;  %805 = vmatmul.mubr.bf16.gmra.mrb[20].mxu1 %v1479_v7 }
  0x5d   : > { %748 = vmatprep.mubr.bf16.mxu0 %v1480_v8  ;;  %812 = vmatprep.mubr.bf16.mxu1 %v1482_v9 }
  0x64   : > { %749 = vmatmul.mubr.bf16.gmra.mrb[24].mxu0 %v1484_v10  ;;  %813 = vmatmul.mubr.bf16.gmra.mrb[24].mxu1 %v1485_v11 }
  0x65   : > { %756 = vmatprep.mubr.bf16.mxu0 %v1486_v12  ;;  %820 = vmatprep.mubr.bf16.mxu1 %v1488_v13 }
  0x6c   : > { %757 = vmatmul.mubr.bf16.gmra.mrb[28].mxu0 %v1490_v14  ;;  %821 = vmatmul.mubr.bf16.gmra.mrb[28].mxu1 %v1491_v15 }
 0x107   : > { %v1308_v16 = vpop.f32.mrb[0].mxu0  ;;  %v1356_v17 = vpop.f32.mrb[0].mxu1 }
 0x108   : > { %v1309_v20 = vpop.f32.mrb[1].mxu0  ;;  %v1357_v21 = vpop.f32.mrb[1].mxu1 }
 0x109   : > { %v1310_v46 = vadd.f32 %v1309_v20, %v1308_v16  ;;  %v1358_v47 = vadd.f32 %v1357_v21, %v1356_v17  ;;  %v1311_v48 = vpop.f32.mrb[2].mxu0  ;;  %v1359_v49 = vpop.f32.mrb[2].mxu1 }
 0x10a   : > { %v1312_v53 = vpop.f32.mrb[3].mxu0  ;;  %v1360_v54 = vpop.f32.mrb[3].mxu1 }
 0x10b   : > { %928 = vst [vmem:[%s1649_s5] sm:$0xff] %v1310_v46  ;;  %v992_v58 = vadd.f32 %v1310_v46, %v960_v18  ;;  %944 = vst [vmem:[%s1649_s5 + $0x80] sm:$0xff] %v1358_v47  ;;  %v1008_v59 = vadd.f32 %v1358_v47, %v976_v19  ;;  %v1313_v60 = vadd.f32 %v1312_v53, %v1311_v48 }
 0x10c   : > { %v1361_v61 = vadd.f32 %v1360_v54, %v1359_v49 }
 0x10d   : > { %929 = vst [vmem:[%s1649_s5 + $0x8] sm:$0xff] %v1313_v60  ;;  %v993_v62 = vadd.f32 %v1313_v60, %v961_v22  ;;  %1024 = vst [vmem:[%s1728_s8] sm:$0xff] %v992_v58 }
 0x10e   : > { %945 = vst [vmem:[%s1649_s5 + $0x88] sm:$0xff] %v1361_v61  ;;  %v1009_v63 = vadd.f32 %v1361_v61, %v977_v23  ;;  %1040 = vst [vmem:[%s1728_s8 + $0x80] sm:$0xff] %v1008_v59 }
 0x10f   : > { %v1314_v0 = vpop.f32.mrb[4].mxu0  ;;  %v1362_v1 = vpop.f32.mrb[4].mxu1  ;;  %1025 = vst [vmem:[%s1728_s8 + $0x8] sm:$0xff] %v993_v62 }
 0x110   : > { %1041 = vst [vmem:[%s1728_s8 + $0x88] sm:$0xff] %v1009_v63  ;;  %v1315_v2 = vpop.f32.mrb[5].mxu0  ;;  %v1363_v3 = vpop.f32.mrb[5].mxu1 }
 0x111   : > { %v1316_v4 = vadd.f32 %v1315_v2, %v1314_v0  ;;  %v1364_v5 = vadd.f32 %v1363_v3, %v1362_v1  ;;  %v1317_v6 = vpop.f32.mrb[6].mxu0  ;;  %v1365_v7 = vpop.f32.mrb[6].mxu1 }
 0x112   : > { %v1318_v8 = vpop.f32.mrb[7].mxu0  ;;  %v1366_v9 = vpop.f32.mrb[7].mxu1 }
 0x113   : > { %930 = vst [vmem:[%s1649_s5 + $0x10] sm:$0xff] %v1316_v4  ;;  %v994_v10 = vadd.f32 %v1316_v4, %v962_v24  ;;  %946 = vst [vmem:[%s1649_s5 + $0x90] sm:$0xff] %v1364_v5  ;;  %v1010_v11 = vadd.f32 %v1364_v5, %v978_v25  ;;  %v1319_v12 = vadd.f32 %v1318_v8, %v1317_v6 }
 0x114   : > { %v1367_v13 = vadd.f32 %v1366_v9, %v1365_v7 }
 0x115   : > { %931 = vst [vmem:[%s1649_s5 + $0x18] sm:$0xff] %v1319_v12  ;;  %v995_v14 = vadd.f32 %v1319_v12, %v1656_v26  ;;  %1026 = vst [vmem:[%s1728_s8 + $0x10] sm:$0xff] %v994_v10 }
 0x116   : > { %947 = vst [vmem:[%s1649_s5 + $0x98] sm:$0xff] %v1367_v13  ;;  %v1011_v15 = vadd.f32 %v1367_v13, %v1659_v27  ;;  %1042 = vst [vmem:[%s1728_s8 + $0x90] sm:$0xff] %v1010_v11 }
 0x117   : > { %v1320_v16 = vpop.f32.mrb[8].mxu0  ;;  %v1368_v17 = vpop.f32.mrb[8].mxu1  ;;  %1027 = vst [vmem:[%s1728_s8 + $0x18] sm:$0xff] %v995_v14 }
 0x118   : > { %1043 = vst [vmem:[%s1728_s8 + $0x98] sm:$0xff] %v1011_v15  ;;  %v1321_v18 = vpop.f32.mrb[9].mxu0  ;;  %v1369_v19 = vpop.f32.mrb[9].mxu1 }
 0x119   : > { %v1322_v20 = vadd.f32 %v1321_v18, %v1320_v16  ;;  %v1370_v21 = vadd.f32 %v1369_v19, %v1368_v17  ;;  %v1323_v22 = vpop.f32.mrb[10].mxu0  ;;  %v1371_v23 = vpop.f32.mrb[10].mxu1 }
 0x11a   : > { %v1324_v24 = vpop.f32.mrb[11].mxu0  ;;  %v1372_v25 = vpop.f32.mrb[11].mxu1 }
 0x11b   : > { %932 = vst [vmem:[%s1649_s5 + $0x20] sm:$0xff] %v1322_v20  ;;  %v996_v26 = vadd.f32 %v1322_v20, %v1662_v28  ;;  %948 = vst [vmem:[%s1649_s5 + $0xa0] sm:$0xff] %v1370_v21  ;;  %v1012_v27 = vadd.f32 %v1370_v21, %v1665_v29  ;;  %v1325_v46 = vadd.f32 %v1324_v24, %v1323_v22 }
 0x11c   : > { %v1373_v47 = vadd.f32 %v1372_v25, %v1371_v23 }
 0x11d   : > { %933 = vst [vmem:[%s1649_s5 + $0x28] sm:$0xff] %v1325_v46  ;;  %v997_v48 = vadd.f32 %v1325_v46, %v1668_v30  ;;  %1028 = vst [vmem:[%s1728_s8 + $0x20] sm:$0xff] %v996_v26 }
 0x11e   : > { %949 = vst [vmem:[%s1649_s5 + $0xa8] sm:$0xff] %v1373_v47  ;;  %v1013_v49 = vadd.f32 %v1373_v47, %v1671_v31  ;;  %1044 = vst [vmem:[%s1728_s8 + $0xa0] sm:$0xff] %v1012_v27 }
 0x11f   : > { %v1326_v53 = vpop.f32.mrb[12].mxu0  ;;  %v1374_v54 = vpop.f32.mrb[12].mxu1  ;;  %1029 = vst [vmem:[%s1728_s8 + $0x28] sm:$0xff] %v997_v48 }
 0x120   : > { %1045 = vst [vmem:[%s1728_s8 + $0xa8] sm:$0xff] %v1013_v49  ;;  %v1327_v28 = vpop.f32.mrb[13].mxu0  ;;  %v1375_v29 = vpop.f32.mrb[13].mxu1 }
 0x121   : > { %v1328_v58 = vadd.f32 %v1327_v28, %v1326_v53  ;;  %v1376_v59 = vadd.f32 %v1375_v29, %v1374_v54  ;;  %v1329_v30 = vpop.f32.mrb[14].mxu0  ;;  %v1377_v60 = vpop.f32.mrb[14].mxu1 }
 0x122   : > { %v1330_v61 = vpop.f32.mrb[15].mxu0  ;;  %v1378_v31 = vpop.f32.mrb[15].mxu1 }
 0x123   : > { %934 = vst [vmem:[%s1649_s5 + $0x30] sm:$0xff] %v1328_v58  ;;  %v998_v62 = vadd.f32 %v1328_v58, %v1674_v32  ;;  %950 = vst [vmem:[%s1649_s5 + $0xb0] sm:$0xff] %v1376_v59  ;;  %v1014_v63 = vadd.f32 %v1376_v59, %v1677_v33  ;;  %v1331_v0 = vadd.f32 %v1330_v61, %v1329_v30 }
 0x124   : > { %v1379_v1 = vadd.f32 %v1378_v31, %v1377_v60 }
 0x125   : > { %935 = vst [vmem:[%s1649_s5 + $0x38] sm:$0xff] %v1331_v0  ;;  %v999_v2 = vadd.f32 %v1331_v0, %v1680_v34  ;;  %1030 = vst [vmem:[%s1728_s8 + $0x30] sm:$0xff] %v998_v62 }
 0x126   : > { %951 = vst [vmem:[%s1649_s5 + $0xb8] sm:$0xff] %v1379_v1  ;;  %v1015_v3 = vadd.f32 %v1379_v1, %v1683_v35  ;;  %1046 = vst [vmem:[%s1728_s8 + $0xb0] sm:$0xff] %v1014_v63 }
 0x127   : > { %v1332_v4 = vpop.f32.mrb[16].mxu0  ;;  %v1380_v5 = vpop.f32.mrb[16].mxu1  ;;  %1031 = vst [vmem:[%s1728_s8 + $0x38] sm:$0xff] %v999_v2 }
 0x128   : > { %1047 = vst [vmem:[%s1728_s8 + $0xb8] sm:$0xff] %v1015_v3  ;;  %v1333_v32 = vpop.f32.mrb[17].mxu0  ;;  %v1381_v33 = vpop.f32.mrb[17].mxu1 }
 0x129   : > { %v1334_v6 = vadd.f32 %v1333_v32, %v1332_v4  ;;  %v1382_v7 = vadd.f32 %v1381_v33, %v1380_v5  ;;  %v1335_v34 = vpop.f32.mrb[18].mxu0  ;;  %v1383_v8 = vpop.f32.mrb[18].mxu1 }
 0x12a   : > { %v1336_v9 = vpop.f32.mrb[19].mxu0  ;;  %v1384_v35 = vpop.f32.mrb[19].mxu1 }
 0x12b   : > { %936 = vst [vmem:[%s1649_s5 + $0x40] sm:$0xff] %v1334_v6  ;;  %v1000_v10 = vadd.f32 %v1334_v6, %v1686_v36  ;;  %952 = vst [vmem:[%s1649_s5 + $0xc0] sm:$0xff] %v1382_v7  ;;  %v1016_v11 = vadd.f32 %v1382_v7, %v1689_v37  ;;  %v1337_v12 = vadd.f32 %v1336_v9, %v1335_v34 }
 0x12c   : > { %v1385_v13 = vadd.f32 %v1384_v35, %v1383_v8 }
 0x12d   : > { %937 = vst [vmem:[%s1649_s5 + $0x48] sm:$0xff] %v1337_v12  ;;  %v1001_v14 = vadd.f32 %v1337_v12, %v1692_v38  ;;  %1032 = vst [vmem:[%s1728_s8 + $0x40] sm:$0xff] %v1000_v10 }
 0x12e   : > { %953 = vst [vmem:[%s1649_s5 + $0xc8] sm:$0xff] %v1385_v13  ;;  %v1017_v15 = vadd.f32 %v1385_v13, %v1695_v39  ;;  %1048 = vst [vmem:[%s1728_s8 + $0xc0] sm:$0xff] %v1016_v11 }
 0x12f   : > { %v1338_v16 = vpop.f32.mrb[20].mxu0  ;;  %v1386_v17 = vpop.f32.mrb[20].mxu1  ;;  %1033 = vst [vmem:[%s1728_s8 + $0x48] sm:$0xff] %v1001_v14 }
 0x130   : > { %1049 = vst [vmem:[%s1728_s8 + $0xc8] sm:$0xff] %v1017_v15  ;;  %v1339_v36 = vpop.f32.mrb[21].mxu0  ;;  %v1387_v37 = vpop.f32.mrb[21].mxu1 }
 0x131   : > { %v1340_v18 = vadd.f32 %v1339_v36, %v1338_v16  ;;  %v1388_v19 = vadd.f32 %v1387_v37, %v1386_v17  ;;  %v1341_v38 = vpop.f32.mrb[22].mxu0  ;;  %v1389_v20 = vpop.f32.mrb[22].mxu1 }
 0x132   : > { %v1342_v21 = vpop.f32.mrb[23].mxu0  ;;  %v1390_v39 = vpop.f32.mrb[23].mxu1 }
 0x133   : > { %938 = vst [vmem:[%s1649_s5 + $0x50] sm:$0xff] %v1340_v18  ;;  %v1002_v22 = vadd.f32 %v1340_v18, %v1698_v40  ;;  %954 = vst [vmem:[%s1649_s5 + $0xd0] sm:$0xff] %v1388_v19  ;;  %v1018_v23 = vadd.f32 %v1388_v19, %v1701_v41  ;;  %v1343_v24 = vadd.f32 %v1342_v21, %v1341_v38 }
 0x134   : > { %v1391_v25 = vadd.f32 %v1390_v39, %v1389_v20 }
 0x135   : > { %939 = vst [vmem:[%s1649_s5 + $0x58] sm:$0xff] %v1343_v24  ;;  %v1003_v26 = vadd.f32 %v1343_v24, %v1704_v42  ;;  %1034 = vst [vmem:[%s1728_s8 + $0x50] sm:$0xff] %v1002_v22 }
 0x136   : > { %955 = vst [vmem:[%s1649_s5 + $0xd8] sm:$0xff] %v1391_v25  ;;  %v1019_v27 = vadd.f32 %v1391_v25, %v1707_v43  ;;  %1050 = vst [vmem:[%s1728_s8 + $0xd0] sm:$0xff] %v1018_v23 }
 0x137   : > { %v1344_v46 = vpop.f32.mrb[24].mxu0  ;;  %v1392_v47 = vpop.f32.mrb[24].mxu1  ;;  %1035 = vst [vmem:[%s1728_s8 + $0x58] sm:$0xff] %v1003_v26 }
 0x138   : > { %1051 = vst [vmem:[%s1728_s8 + $0xd8] sm:$0xff] %v1019_v27  ;;  %v1345_v40 = vpop.f32.mrb[25].mxu0  ;;  %v1393_v41 = vpop.f32.mrb[25].mxu1 }
 0x139   : > { %v1346_v48 = vadd.f32 %v1345_v40, %v1344_v46  ;;  %v1394_v49 = vadd.f32 %v1393_v41, %v1392_v47  ;;  %v1347_v42 = vpop.f32.mrb[26].mxu0  ;;  %v1395_v53 = vpop.f32.mrb[26].mxu1 }
 0x13a   : > { %v1348_v54 = vpop.f32.mrb[27].mxu0  ;;  %v1396_v43 = vpop.f32.mrb[27].mxu1 }
 0x13b   : > { %940 = vst [vmem:[%s1649_s5 + $0x60] sm:$0xff] %v1346_v48  ;;  %v1004_v28 = vadd.f32 %v1346_v48, %v1710_v44  ;;  %956 = vst [vmem:[%s1649_s5 + $0xe0] sm:$0xff] %v1394_v49  ;;  %v1020_v29 = vadd.f32 %v1394_v49, %v1713_v45  ;;  %v1349_v58 = vadd.f32 %v1348_v54, %v1347_v42 }
 0x13c   : > { %v1397_v59 = vadd.f32 %v1396_v43, %v1395_v53 }
 0x13d   : > { %941 = vst [vmem:[%s1649_s5 + $0x68] sm:$0xff] %v1349_v58  ;;  %v1005_v30 = vadd.f32 %v1349_v58, %v1716_v50  ;;  %1036 = vst [vmem:[%s1728_s8 + $0x60] sm:$0xff] %v1004_v28 }
 0x13e   : > { %957 = vst [vmem:[%s1649_s5 + $0xe8] sm:$0xff] %v1397_v59  ;;  %v1021_v60 = vadd.f32 %v1397_v59, %v1719_v51  ;;  %1052 = vst [vmem:[%s1728_s8 + $0xe0] sm:$0xff] %v1020_v29 }
 0x13f   : > { %v1350_v61 = vpop.f32.mrb[28].mxu0  ;;  %v1398_v31 = vpop.f32.mrb[28].mxu1  ;;  %1037 = vst [vmem:[%s1728_s8 + $0x68] sm:$0xff] %v1005_v30 }
 0x140   : > { %1053 = vst [vmem:[%s1728_s8 + $0xe8] sm:$0xff] %v1021_v60  ;;  %v1351_v44 = vpop.f32.mrb[29].mxu0  ;;  %v1399_v45 = vpop.f32.mrb[29].mxu1 }
 0x141   : > { %v1352_v62 = vadd.f32 %v1351_v44, %v1350_v61  ;;  %v1400_v63 = vadd.f32 %v1399_v45, %v1398_v31  ;;  %v1353_v50 = vpop.f32.mrb[30].mxu0  ;;  %v1401_v0 = vpop.f32.mrb[30].mxu1 }
 0x142   : > { %v1354_v51 = vpop.f32.mrb[31].mxu0  ;;  %v1402_v1 = vpop.f32.mrb[31].mxu1 }
 0x143   : > { %942 = vst [vmem:[%s1649_s5 + $0x70] sm:$0xff] %v1352_v62  ;;  %v1006_v2 = vadd.f32 %v1352_v62, %v1722_v52  ;;  %958 = vst [vmem:[%s1649_s5 + $0xf0] sm:$0xff] %v1400_v63  ;;  %v1022_v3 = vadd.f32 %v1400_v63, %v1731_v55  ;;  %v1355_v4 = vadd.f32 %v1354_v51, %v1353_v50 }
 0x144   : > { %v1403_v5 = vadd.f32 %v1402_v1, %v1401_v0 }
 0x145   : > { %943 = vst [vmem:[%s1649_s5 + $0x78] sm:$0xff] %v1355_v4  ;;  %v1007_v32 = vadd.f32 %v1355_v4, %v1734_v56  ;;  %1038 = vst [vmem:[%s1728_s8 + $0x70] sm:$0xff] %v1006_v2 }
 0x146   : > { %959 = vst [vmem:[%s1649_s5 + $0xf8] sm:$0xff] %v1403_v5  ;;  %v1023_v33 = vadd.f32 %v1403_v5, %v1737_v57  ;;  %1054 = vst [vmem:[%s1728_s8 + $0xf0] sm:$0xff] %v1022_v3 }
 0x147   : > { %1039 = vst [vmem:[%s1728_s8 + $0x78] sm:$0xff] %v1007_v32 }
 0x148   : > { %1055 = vst [vmem:[%s1728_s8 + $0xf8] sm:$0xff] %v1023_v33 }
 0x149 PF: > { %s15_s17 = sadd.s32 1, %s1514_s17   ;;  %s1843_s15 = smov %s1510_s16 }
 0x14a   : > { %p12_p5 = scmp.ge.s32.totalorder %s15_s17, 5   ;;  %s1844_s16 = smov %s1846_s18 }
 0x14c   :  { %14 = sbr.rel (!%p12_p5) target bundleno = 2 (0x2), region = 88 }

</bundles_post_ra>
